<compile_context>
chip_gen: v6e
topology: v6e:2x2x1
jax: 0.10.0
libtpu: 0.0.40
codegen_flags: <defaults>
</compile_context>

<pallas_src>
import functools

import jax
import jax.numpy as jnp
from jax.experimental import pallas as pl
from jax.experimental.pallas import tpu as pltpu


# ---------------------------------------------------------------------------
# Pallas kernels
# ---------------------------------------------------------------------------
def _conv3x3_kernel(x_ref, w_ref, b_ref, sc_ref, sh_ref, imask_ref,
                    omr_ref, omc_ref, o_ref, stats_ref, *scratch,
                    wp, lo, apply_in_bn, emit_padded, build_pad, img_hw):
    """3x3 conv + bias + ReLU on a spatially-flattened image (channels on
    sublanes, flattened spatial on lanes) + per-image BN partial stats.

      x_ref     : (1, Cin, Lin)    flattened input slab
      w_ref     : (Cout, 9*Cin)    stacked-K weights (bf16)
      b_ref     : (Cout, 1)
      sc_ref    : (Cin, 1)         fused input-BN scale (iff apply_in_bn)
      sh_ref    : (Cin, 1)         fused input-BN shift (iff apply_in_bn)
      imask_ref : (1, Lin)         1.0 on real (non-padding) input positions
      omr_ref   : (1, Lo)          1.0 on valid output columns (row mask)
      omc_ref   : (Lo, 1)          same mask as a column (for MXU reductions)
      o_ref     : (1, Cout, Lout)
      stats_ref : (1, Cout, 2)     [:, :, 0]=sum, [:, :, 1]=sum of squares
    """
    cout = o_ref.shape[1]
    lin_need = lo + 2 * wp + 2

    # ---- gather / pad the input slab ----
    if build_pad:
        # Build the zero-padded flattened layout directly in VMEM scratch
        # (removes the wrapper-side jnp.pad HBM pass for conv1).
        pad_ref = scratch[0]
        h_img, w_img = img_hw
        pad_ref[...] = jnp.zeros_like(pad_ref)
        for r in range(h_img):
            dst = (r + 1) * wp + 1
            pad_ref[:, dst:dst + w_img] = x_ref[0, :, r * w_img:(r + 1) * w_img]
        x = pad_ref[...].astype(jnp.bfloat16)
    else:
        x = x_ref[0]
        if apply_in_bn:
            # Previous layer's BatchNorm affine, fused here.  The shift is
            # masked so structural zero-padding positions stay exactly zero.
            x = (x.astype(jnp.float32) * sc_ref[...]
                 + sh_ref[...] * imask_ref[...])
        x = x.astype(jnp.bfloat16)
        if x.shape[-1] < lin_need:                       # tail room for taps
            x = jnp.pad(x, ((0, 0), (0, lin_need - x.shape[-1])))

    # ---- im2col stack -> ONE (Cout, 9*Cin) @ (9*Cin, Lo) bf16 MXU matmul ----
    taps = []
    for kh in range(3):
        for kw in range(3):
            off = kh * wp + kw
            taps.append(x[:, off:off + lo])
    xs = jnp.concatenate(taps, axis=0)                   # (9*Cin, Lo) bf16
    y = jnp.dot(w_ref[...], xs, preferred_element_type=jnp.float32)
    y = jnp.maximum(y + b_ref[...], 0.0)                 # bias + ReLU (f32)

    # ---- BN partial stats over valid pixels, via the MXU ----
    omc = omc_ref[...]
    ssum = jnp.dot(y, omc, preferred_element_type=jnp.float32)      # (Cout,1)
    ssq = jnp.dot(y * y, omc, preferred_element_type=jnp.float32)   # (Cout,1)
    stats_ref[0] = jnp.concatenate([ssum, ssq], axis=1)             # (Cout,2)

    # ---- store ----
    if emit_padded:
        # Write directly in the NEXT conv's flattened zero-padded layout with
        # direct static-offset stores (no concatenate of the full slab).
        ym = (y * omr_ref[...]).astype(o_ref.dtype)      # zero the pad columns
        head = wp + 1
        lout = o_ref.shape[2]
        o_ref[0, :, 0:head] = jnp.zeros((cout, head), o_ref.dtype)
        o_ref[0, :, head:head + lo] = ym
        o_ref[0, :, head + lo:lout] = jnp.zeros((cout, lout - head - lo),
                                                o_ref.dtype)
    else:
        o_ref[0] = y.astype(o_ref.dtype)


def _bn_crop_kernel(x_ref, sc_ref, sh_ref, o_ref, *, wp, wo, ho):
    """Final BN affine fused with the crop from row-stride wp to width wo.

      x_ref : (1, C, ho*wp)   flattened conv output (bf16)
      o_ref : (1, C, ho*wo)   cropped, affine-transformed output
    """
    if wo == wp:
        xc = x_ref[0].astype(jnp.float32)
    else:
        rows = [x_ref[0, :, r * wp:r * wp + wo] for r in range(ho)]
        xc = jnp.concatenate(rows, axis=1).astype(jnp.float32)
    o_ref[0] = (xc * sc_ref[...] + sh_ref[...]).astype(o_ref.dtype)


# ---------------------------------------------------------------------------
# Wrappers
# ---------------------------------------------------------------------------
def _mosaic_params(block_bytes):
    # Scoped-VMEM request derived from the actual block sizes, capped well
    # below v7x's 64 MiB/TC physical VMEM (also safe on v5e/v6e's 128 MiB).
    need = 3 * int(block_bytes) + (8 << 20)
    return pltpu.CompilerParams(
        dimension_semantics=("parallel",),
        vmem_limit_bytes=int(min(max(need, 16 << 20), 48 << 20)))


def _stack_weights(w_hwio):
    """(3,3,Cin,Cout) HWIO -> (Cout, 9*Cin) bf16 stacked-K weights."""
    _, _, cin, cout = w_hwio.shape
    w = w_hwio.reshape(9, cin, cout)
    return jnp.transpose(w, (2, 0, 1)).reshape(cout, 9 * cin).astype(jnp.bfloat16)


def _in_mask(hp, wp, win, pad, lin_in):
    idx = jnp.arange(lin_in)
    row, col = idx // wp, idx % wp
    m = ((row >= pad) & (row < hp - pad) &
         (col >= pad) & (col < win - pad) & (idx < hp * wp))
    return m.astype(jnp.float32).reshape(1, lin_in)


def _out_masks(hp, wp, win):
    lo = (hp - 2) * wp
    v = ((jnp.arange(lo) % wp) < (win - 2)).astype(jnp.float32)
    return v.reshape(1, lo), v.reshape(lo, 1)


def _bn_scale_shift(stats, count, gamma, beta, eps):
    s = jnp.sum(stats[:, :, 0], axis=0)                 # (C,)
    ss = jnp.sum(stats[:, :, 1], axis=0)                # (C,)
    mean = s / count
    var = jnp.maximum(ss / count - mean * mean, 0.0)    # biased (training mode)
    scale = gamma / jnp.sqrt(var + eps)
    shift = beta - mean * scale
    return (scale.reshape(-1, 1).astype(jnp.float32),
            shift.reshape(-1, 1).astype(jnp.float32))


def _conv_layer(x_flat, w_stk, bias, sc, sh, imask, omask_row, omask_col, *,
                hp, wp, win, apply_in_bn, emit_padded, build_pad, img_hw):
    n, cin, lin_in = x_flat.shape
    cout = w_stk.shape[0]
    ho = hp - 2
    lo = ho * wp
    lin_need = lo + 2 * wp + 2
    lout = lin_need if emit_padded else lo

    kernel = functools.partial(
        _conv3x3_kernel, wp=wp, lo=lo, apply_in_bn=apply_in_bn,
        emit_padded=emit_padded, build_pad=build_pad, img_hw=img_hw)

    scratch = (pltpu.VMEM((cin, lin_need), jnp.float32),) if build_pad else ()

    block_bytes = (cin * lin_in * x_flat.dtype.itemsize
                   + w_stk.size * 2
                   + 4 * (cout + 2 * cin + lin_in + 2 * lo)
                   + cout * lout * 2 + cout * 2 * 4
                   + (cin * lin_need * 4 if build_pad else 0))

    return pl.pallas_call(
        kernel,
        out_shape=(jax.ShapeDtypeStruct((n, cout, lout), jnp.bfloat16),
                   jax.ShapeDtypeStruct((n, cout, 2), jnp.float32)),
        grid=(n,),
        in_specs=[
            pl.BlockSpec((1, cin, lin_in), lambda i: (i, 0, 0)),
            pl.BlockSpec((cout, 9 * cin), lambda i: (0, 0)),
            pl.BlockSpec((cout, 1), lambda i: (0, 0)),
            pl.BlockSpec((cin, 1), lambda i: (0, 0)),
            pl.BlockSpec((cin, 1), lambda i: (0, 0)),
            pl.BlockSpec((1, lin_in), lambda i: (0, 0)),
            pl.BlockSpec((1, lo), lambda i: (0, 0)),
            pl.BlockSpec((lo, 1), lambda i: (0, 0)),
        ],
        out_specs=(
            pl.BlockSpec((1, cout, lout), lambda i: (i, 0, 0)),
            pl.BlockSpec((1, cout, 2), lambda i: (i, 0, 0)),
        ),
        scratch_shapes=scratch,
        compiler_params=_mosaic_params(block_bytes),
    )(x_flat, w_stk, bias.reshape(cout, 1).astype(jnp.float32),
      sc, sh, imask, omask_row, omask_col)


def _bn_crop_apply(y_flat, sc, sh, *, wp, wo, ho, out_dtype):
    n, c, lo = y_flat.shape
    kernel = functools.partial(_bn_crop_kernel, wp=wp, wo=wo, ho=ho)
    block_bytes = c * lo * y_flat.dtype.itemsize + c * ho * wo * 4 + 8 * c
    return pl.pallas_call(
        kernel,
        out_shape=jax.ShapeDtypeStruct((n, c, ho * wo), out_dtype),
        grid=(n,),
        in_specs=[pl.BlockSpec((1, c, lo), lambda i: (i, 0, 0)),
                  pl.BlockSpec((c, 1), lambda i: (0, 0)),
                  pl.BlockSpec((c, 1), lambda i: (0, 0))],
        out_specs=pl.BlockSpec((1, c, ho * wo), lambda i: (i, 0, 0)),
        compiler_params=_mosaic_params(block_bytes),
    )(y_flat, sc, sh)


def init_unet_conv_block_params(key, in_chans, out_chans):
    k1, k2, k3, k4, k5, k6 = jax.random.split(key, 6)
    return {
        "w1": 0.1 * jax.random.normal(k1, (3, 3, in_chans, out_chans), jnp.float32),
        "b1": 0.05 * jax.random.normal(k2, (out_chans,), jnp.float32),
        "gamma1": 1.0 + 0.1 * jax.random.normal(k5, (out_chans,), jnp.float32),
        "beta1": 0.1 * jax.random.normal(k6, (out_chans,), jnp.float32),
        "w2": 0.1 * jax.random.normal(k3, (3, 3, out_chans, out_chans), jnp.float32),
        "b2": 0.05 * jax.random.normal(k4, (out_chans,), jnp.float32),
        "gamma2": jnp.ones((out_chans,), jnp.float32),
        "beta2": jnp.zeros((out_chans,), jnp.float32),
    }


@functools.partial(jax.jit, static_argnames=("padding", "batch_norm"))
def unet_conv_block(x_nchw, params, padding=True, batch_norm=True, eps=1e-5):
    p = int(padding)
    n, cin, h, w = x_nchw.shape
    cout = params["w1"].shape[-1]
    f32 = jnp.float32

    w1 = _stack_weights(params["w1"])
    w2 = _stack_weights(params["w2"])
    ones_c = lambda c: jnp.ones((c, 1), f32)
    zeros_c = lambda c: jnp.zeros((c, 1), f32)

    # ---- conv1 + ReLU (+ BN1 partial stats) ----
    hp1, wp1 = h + 2 * p, w + 2 * p
    win1 = wp1 if p else w
    ho1, wo1 = hp1 - 2, win1 - 2
    chain = (p == 1)                 # conv1 emits conv2's padded layout directly
    omr1, omc1 = _out_masks(hp1, wp1, win1)
    x_flat = x_nchw.reshape(n, cin, h * w)
    y1, st1 = _conv_layer(
        x_flat, w1, params["b1"], ones_c(cin), zeros_c(cin),
        jnp.ones((1, h * w), f32), omr1, omc1,
        hp=hp1, wp=wp1, win=win1, apply_in_bn=False,
        emit_padded=chain, build_pad=(p == 1), img_hw=(h, w))

    # ---- conv2 + ReLU (+ BN2 partial stats), BN1 affine fused on its input ----
    if chain:
        hp2, wp2, win2 = ho1 + 2, wp1, wp1
    else:
        hp2, wp2, win2 = ho1, wp1, wo1
    ho2, wo2 = hp2 - 2, win2 - 2

    if batch_norm:
        sc1, sh1 = _bn_scale_shift(st1, n * ho1 * wo1,
                                   params["gamma1"], params["beta1"], eps)
    else:
        sc1, sh1 = ones_c(cout), zeros_c(cout)
    imask2 = _in_mask(hp2, wp2, win2, p, y1.shape[-1])
    omr2, omc2 = _out_masks(hp2, wp2, win2)
    y2, st2 = _conv_layer(
        y1, w2, params["b2"], sc1, sh1, imask2, omr2, omc2,
        hp=hp2, wp=wp2, win=win2, apply_in_bn=batch_norm,
        emit_padded=False, build_pad=False, img_hw=None)

    # ---- final BN2 affine fused with the NCHW crop ----
    if batch_norm:
        sc2, sh2 = _bn_scale_shift(st2, n * ho2 * wo2,
                                   params["gamma2"], params["beta2"], eps)
    else:
        sc2, sh2 = ones_c(cout), zeros_c(cout)
    out = _bn_crop_apply(y2, sc2, sh2, wp=wp2, wo=wo2, ho=ho2,
                         out_dtype=x_nchw.dtype)
    return out.reshape(n, cout, ho2, wo2)     # contiguous reshape, no copy


# ---------------------------------------------------------------------------
# Pure-JAX reference (sanity check only)
# ---------------------------------------------------------------------------
def _ref_block(x_nchw, params, padding=True, batch_norm=True, eps=1e-5):
    def conv(x, w_hwio, b, p):
        y = jax.lax.conv_general_dilated(
            x, w_hwio, window_strides=(1, 1), padding=[(p, p), (p, p)],
            dimension_numbers=("NCHW", "HWIO", "NCHW"))
        return jnp.maximum(y + b[None, :, None, None], 0.0)

    def bn(x, g, bta):
        m = jnp.mean(x, axis=(0, 2, 3), keepdims=True)
        v = jnp.mean(jnp.square(x - m), axis=(0, 2, 3), keepdims=True)
        return (x - m) / jnp.sqrt(v + eps) * g[None, :, None, None] \
            + bta[None, :, None, None]

    p = int(padding)
    x = conv(x_nchw, params["w1"], params["b1"], p)
    if batch_norm:
        x = bn(x, params["gamma1"], params["beta1"])
    x = conv(x, params["w2"], params["b2"], p)
    if batch_norm:
        x = bn(x, params["gamma2"], params["beta2"])
    return x


if __name__ == "__main__":
    key = jax.random.PRNGKey(0)
    kx, kp = jax.random.split(key)

    in_chans, out_chans = 4, 8
    x = jax.random.normal(kx, (2, in_chans, 16, 16), jnp.float32)   # NCHW
    params = init_unet_conv_block_params(kp, in_chans, out_chans)

    # padding=True, batch_norm=True (main config)
    out = jax.block_until_ready(
        unet_conv_block(x, params, padding=True, batch_norm=True))
    assert out.shape == (2, out_chans, 16, 16), out.shape
    ref = _ref_block(x, params, padding=True, batch_norm=True)
    assert jnp.allclose(out, ref, atol=4e-2, rtol=4e-2), \
        float(jnp.max(jnp.abs(out - ref)))

    # padding=False, batch_norm=False (exercises the non-chained path)
    out2 = jax.block_until_ready(
        unet_conv_block(x, params, padding=False, batch_norm=False))
    assert out2.shape == (2, out_chans, 12, 12), out2.shape
    ref2 = _ref_block(x, params, padding=False, batch_norm=False)
    assert jnp.allclose(out2, ref2, atol=4e-2, rtol=4e-2), \
        float(jnp.max(jnp.abs(out2 - ref2)))

    print("KERNEL_OK")
</pallas_src>

<mosaic_0001>
module attributes {stable_mosaic.version = 11 : i64} {
  func.func @_conv3x3_kernel(%arg0: i32, %arg1: memref<1x8x326xbf16, #tpu.memory_space<vmem>>, %arg2: memref<8x72xbf16, #tpu.memory_space<vmem>>, %arg3: memref<8x1xf32, #tpu.memory_space<vmem>>, %arg4: memref<8x1xf32, #tpu.memory_space<vmem>>, %arg5: memref<8x1xf32, #tpu.memory_space<vmem>>, %arg6: memref<1x326xf32, #tpu.memory_space<vmem>>, %arg7: memref<1x288xf32, #tpu.memory_space<vmem>>, %arg8: memref<288x1xf32, #tpu.memory_space<vmem>>, %arg9: memref<1x8x288xbf16, #tpu.memory_space<vmem>>, %arg10: memref<1x8x2xf32, #tpu.memory_space<vmem>>) attributes {dimension_semantics = [#tpu.dimension_semantics<parallel>], iteration_bounds = array<i64: 2>, scalar_prefetch = 0 : i64, scratch_operands = 0 : i64, tpu.core_type = #tpu.core_type<tc>, window_params = [{transform_indices = @transform_0, window_bounds = array<i64: 1, 8, 326>}, {pipeline_mode = #tpu.pipeline_mode<synchronous>, transform_indices = @transform_1, window_bounds = array<i64: 8, 72>}, {pipeline_mode = #tpu.pipeline_mode<synchronous>, transform_indices = @transform_2, window_bounds = array<i64: 8, 1>}, {pipeline_mode = #tpu.pipeline_mode<synchronous>, transform_indices = @transform_3, window_bounds = array<i64: 8, 1>}, {pipeline_mode = #tpu.pipeline_mode<synchronous>, transform_indices = @transform_4, window_bounds = array<i64: 8, 1>}, {pipeline_mode = #tpu.pipeline_mode<synchronous>, transform_indices = @transform_5, window_bounds = array<i64: 1, 326>}, {pipeline_mode = #tpu.pipeline_mode<synchronous>, transform_indices = @transform_6, window_bounds = array<i64: 1, 288>}, {pipeline_mode = #tpu.pipeline_mode<synchronous>, transform_indices = @transform_7, window_bounds = array<i64: 288, 1>}, {transform_indices = @transform_8, window_bounds = array<i64: 1, 8, 288>}, {transform_indices = @transform_9, window_bounds = array<i64: 1, 8, 2>}]} {
    %c0 = arith.constant 0 : index
    %c0_0 = arith.constant 0 : index
    %c0_1 = arith.constant 0 : index
    %0 = vector.load %arg1[%c0, %c0_0, %c0_1] : memref<1x8x326xbf16, #tpu.memory_space<vmem>>, vector<1x8x326xbf16>
    %1 = vector.shape_cast %0 : vector<1x8x326xbf16> to vector<8x326xbf16>
    %2 = arith.extf %1 : vector<8x326xbf16> to vector<8x326xf32>
    %c0_2 = arith.constant 0 : index
    %c0_3 = arith.constant 0 : index
    %3 = vector.load %arg4[%c0_2, %c0_3] : memref<8x1xf32, #tpu.memory_space<vmem>>, vector<8x1xf32>
    %4 = vector.broadcast %3 : vector<8x1xf32> to vector<8x326xf32>
    %5 = arith.mulf %2, %4 : vector<8x326xf32>
    %c0_4 = arith.constant 0 : index
    %c0_5 = arith.constant 0 : index
    %6 = vector.load %arg5[%c0_4, %c0_5] : memref<8x1xf32, #tpu.memory_space<vmem>>, vector<8x1xf32>
    %c0_6 = arith.constant 0 : index
    %c0_7 = arith.constant 0 : index
    %7 = vector.load %arg6[%c0_6, %c0_7] : memref<1x326xf32, #tpu.memory_space<vmem>>, vector<1x326xf32>
    %8 = vector.broadcast %6 : vector<8x1xf32> to vector<8x326xf32>
    %9 = vector.broadcast %7 : vector<1x326xf32> to vector<8x326xf32>
    %10 = arith.mulf %8, %9 : vector<8x326xf32>
    %11 = arith.addf %5, %10 : vector<8x326xf32>
    %12 = arith.truncf %11 : vector<8x326xf32> to vector<8x326xbf16>
    %13 = vector.extract_strided_slice %12 {offsets = [0, 0], sizes = [8, 288], strides = [1, 1]} : vector<8x326xbf16> to vector<8x288xbf16>
    %14 = vector.extract_strided_slice %12 {offsets = [0, 1], sizes = [8, 288], strides = [1, 1]} : vector<8x326xbf16> to vector<8x288xbf16>
    %15 = vector.extract_strided_slice %12 {offsets = [0, 2], sizes = [8, 288], strides = [1, 1]} : vector<8x326xbf16> to vector<8x288xbf16>
    %16 = vector.extract_strided_slice %12 {offsets = [0, 18], sizes = [8, 288], strides = [1, 1]} : vector<8x326xbf16> to vector<8x288xbf16>
    %17 = vector.extract_strided_slice %12 {offsets = [0, 19], sizes = [8, 288], strides = [1, 1]} : vector<8x326xbf16> to vector<8x288xbf16>
    %18 = vector.extract_strided_slice %12 {offsets = [0, 20], sizes = [8, 288], strides = [1, 1]} : vector<8x326xbf16> to vector<8x288xbf16>
    %19 = vector.extract_strided_slice %12 {offsets = [0, 36], sizes = [8, 288], strides = [1, 1]} : vector<8x326xbf16> to vector<8x288xbf16>
    %20 = vector.extract_strided_slice %12 {offsets = [0, 37], sizes = [8, 288], strides = [1, 1]} : vector<8x326xbf16> to vector<8x288xbf16>
    %21 = vector.extract_strided_slice %12 {offsets = [0, 38], sizes = [8, 288], strides = [1, 1]} : vector<8x326xbf16> to vector<8x288xbf16>
    %22 = tpu.concatenate %13, %14, %15, %16, %17, %18, %19, %20, %21 in 0 : vector<8x288xbf16>, vector<8x288xbf16>, vector<8x288xbf16>, vector<8x288xbf16>, vector<8x288xbf16>, vector<8x288xbf16>, vector<8x288xbf16>, vector<8x288xbf16>, vector<8x288xbf16> -> vector<72x288xbf16>
    %c0_8 = arith.constant 0 : index
    %c0_9 = arith.constant 0 : index
    %23 = vector.load %arg2[%c0_8, %c0_9] : memref<8x72xbf16, #tpu.memory_space<vmem>>, vector<8x72xbf16>
    %cst = arith.constant dense<0.000000e+00> : vector<8x288xf32>
    %24 = tpu.matmul %23, %22, %cst {dimension_numbers = #tpu.dot_dimension_numbers<[1], [0], [0], [1], [0, 0, 1, 1], [], []>} : vector<8x72xbf16>, vector<72x288xbf16>, vector<8x288xf32> -> vector<8x288xf32>
    %c0_10 = arith.constant 0 : index
    %c0_11 = arith.constant 0 : index
    %25 = vector.load %arg3[%c0_10, %c0_11] : memref<8x1xf32, #tpu.memory_space<vmem>>, vector<8x1xf32>
    %26 = vector.broadcast %25 : vector<8x1xf32> to vector<8x288xf32>
    %27 = arith.addf %24, %26 : vector<8x288xf32>
    %cst_12 = arith.constant 0.000000e+00 : f32
    %28 = vector.broadcast %cst_12 : f32 to vector<8x288xf32>
    %29 = arith.maximumf %27, %28 : vector<8x288xf32>
    %c0_13 = arith.constant 0 : index
    %c0_14 = arith.constant 0 : index
    %30 = vector.load %arg8[%c0_13, %c0_14] : memref<288x1xf32, #tpu.memory_space<vmem>>, vector<288x1xf32>
    %cst_15 = arith.constant dense<0.000000e+00> : vector<8x1xf32>
    %31 = tpu.matmul %29, %30, %cst_15 {dimension_numbers = #tpu.dot_dimension_numbers<[1], [0], [0], [1], [0, 0, 1, 1], [], []>} : vector<8x288xf32>, vector<288x1xf32>, vector<8x1xf32> -> vector<8x1xf32>
    %32 = arith.mulf %29, %29 : vector<8x288xf32>
    %cst_16 = arith.constant dense<0.000000e+00> : vector<8x1xf32>
    %33 = tpu.matmul %32, %30, %cst_16 {dimension_numbers = #tpu.dot_dimension_numbers<[1], [0], [0], [1], [0, 0, 1, 1], [], []>} : vector<8x288xf32>, vector<288x1xf32>, vector<8x1xf32> -> vector<8x1xf32>
    %34 = tpu.concatenate %31, %33 in 1 : vector<8x1xf32>, vector<8x1xf32> -> vector<8x2xf32>
    %c0_17 = arith.constant 0 : index
    %c0_18 = arith.constant 0 : index
    %c0_19 = arith.constant 0 : index
    %35 = vector.load %arg10[%c0_17, %c0_18, %c0_19] : memref<1x8x2xf32, #tpu.memory_space<vmem>>, vector<1x8x2xf32>
    %36 = vector.shape_cast %35 : vector<1x8x2xf32> to vector<8x2xf32>
    %37 = vector.shape_cast %34 : vector<8x2xf32> to vector<1x8x2xf32>
    tpu.vector_store %arg10[%c0_17, %c0_18, %c0_19], %37 {strides = array<i32>} : memref<1x8x2xf32, #tpu.memory_space<vmem>>, vector<1x8x2xf32>,
    %38 = arith.truncf %29 : vector<8x288xf32> to vector<8x288xbf16>
    %c0_20 = arith.constant 0 : index
    %c0_21 = arith.constant 0 : index
    %c0_22 = arith.constant 0 : index
    %39 = vector.load %arg9[%c0_20, %c0_21, %c0_22] : memref<1x8x288xbf16, #tpu.memory_space<vmem>>, vector<1x8x288xbf16>
    %40 = vector.shape_cast %39 : vector<1x8x288xbf16> to vector<8x288xbf16>
    %41 = vector.shape_cast %38 : vector<8x288xbf16> to vector<1x8x288xbf16>
    tpu.vector_store %arg9[%c0_20, %c0_21, %c0_22], %41 {strides = array<i32>} : memref<1x8x288xbf16, #tpu.memory_space<vmem>>, vector<1x8x288xbf16>,
    return
  }
  func.func @transform_0(%arg0: i32) -> (i32, i32, i32) {
    %c0_i32 = arith.constant 0 : i32
    %c0_i32_0 = arith.constant 0 : i32
    %c0_i32_1 = arith.constant 0 : i32
    return %arg0, %c0_i32, %c0_i32_0 : i32, i32, i32
  }
  func.func @transform_1(%arg0: i32) -> (i32, i32) {
    %c0_i32 = arith.constant 0 : i32
    %c0_i32_0 = arith.constant 0 : i32
    %c0_i32_1 = arith.constant 0 : i32
    return %c0_i32, %c0_i32_0 : i32, i32
  }
  func.func @transform_2(%arg0: i32) -> (i32, i32) {
    %c0_i32 = arith.constant 0 : i32
    %c0_i32_0 = arith.constant 0 : i32
    %c0_i32_1 = arith.constant 0 : i32
    return %c0_i32, %c0_i32_0 : i32, i32
  }
  func.func @transform_3(%arg0: i32) -> (i32, i32) {
    %c0_i32 = arith.constant 0 : i32
    %c0_i32_0 = arith.constant 0 : i32
    %c0_i32_1 = arith.constant 0 : i32
    return %c0_i32, %c0_i32_0 : i32, i32
  }
  func.func @transform_4(%arg0: i32) -> (i32, i32) {
    %c0_i32 = arith.constant 0 : i32
    %c0_i32_0 = arith.constant 0 : i32
    %c0_i32_1 = arith.constant 0 : i32
    return %c0_i32, %c0_i32_0 : i32, i32
  }
  func.func @transform_5(%arg0: i32) -> (i32, i32) {
    %c0_i32 = arith.constant 0 : i32
    %c0_i32_0 = arith.constant 0 : i32
    %c0_i32_1 = arith.constant 0 : i32
    return %c0_i32, %c0_i32_0 : i32, i32
  }
  func.func @transform_6(%arg0: i32) -> (i32, i32) {
    %c0_i32 = arith.constant 0 : i32
    %c0_i32_0 = arith.constant 0 : i32
    %c0_i32_1 = arith.constant 0 : i32
    return %c0_i32, %c0_i32_0 : i32, i32
  }
  func.func @transform_7(%arg0: i32) -> (i32, i32) {
    %c0_i32 = arith.constant 0 : i32
    %c0_i32_0 = arith.constant 0 : i32
    %c0_i32_1 = arith.constant 0 : i32
    return %c0_i32, %c0_i32_0 : i32, i32
  }
  func.func @transform_8(%arg0: i32) -> (i32, i32, i32) {
    %c0_i32 = arith.constant 0 : i32
    %c0_i32_0 = arith.constant 0 : i32
    %c0_i32_1 = arith.constant 0 : i32
    return %arg0, %c0_i32, %c0_i32_0 : i32, i32, i32
  }
  func.func @transform_9(%arg0: i32) -> (i32, i32, i32) {
    %c0_i32 = arith.constant 0 : i32
    %c0_i32_0 = arith.constant 0 : i32
    %c0_i32_1 = arith.constant 0 : i32
    return %arg0, %c0_i32, %c0_i32_0 : i32, i32, i32
  }
}

module attributes {stable_mosaic.version = 11 : i64} {
  func.func @_conv3x3_kernel(%arg0: i32, %arg1: memref<1x4x256xf32, #tpu.memory_space<vmem>>, %arg2: memref<8x36xbf16, #tpu.memory_space<vmem>>, %arg3: memref<8x1xf32, #tpu.memory_space<vmem>>, %arg4: memref<4x1xf32, #tpu.memory_space<vmem>>, %arg5: memref<4x1xf32, #tpu.memory_space<vmem>>, %arg6: memref<1x256xf32, #tpu.memory_space<vmem>>, %arg7: memref<1x288xf32, #tpu.memory_space<vmem>>, %arg8: memref<288x1xf32, #tpu.memory_space<vmem>>, %arg9: memref<1x8x326xbf16, #tpu.memory_space<vmem>>, %arg10: memref<1x8x2xf32, #tpu.memory_space<vmem>>, %arg11: memref<4x326xf32, #tpu.memory_space<vmem>>) attributes {dimension_semantics = [#tpu.dimension_semantics<parallel>], iteration_bounds = array<i64: 2>, scalar_prefetch = 0 : i64, scratch_operands = 1 : i64, tpu.core_type = #tpu.core_type<tc>, window_params = [{transform_indices = @transform_0, window_bounds = array<i64: 1, 4, 256>}, {pipeline_mode = #tpu.pipeline_mode<synchronous>, transform_indices = @transform_1, window_bounds = array<i64: 8, 36>}, {pipeline_mode = #tpu.pipeline_mode<synchronous>, transform_indices = @transform_2, window_bounds = array<i64: 8, 1>}, {pipeline_mode = #tpu.pipeline_mode<synchronous>, transform_indices = @transform_3, window_bounds = array<i64: 4, 1>}, {pipeline_mode = #tpu.pipeline_mode<synchronous>, transform_indices = @transform_4, window_bounds = array<i64: 4, 1>}, {pipeline_mode = #tpu.pipeline_mode<synchronous>, transform_indices = @transform_5, window_bounds = array<i64: 1, 256>}, {pipeline_mode = #tpu.pipeline_mode<synchronous>, transform_indices = @transform_6, window_bounds = array<i64: 1, 288>}, {pipeline_mode = #tpu.pipeline_mode<synchronous>, transform_indices = @transform_7, window_bounds = array<i64: 288, 1>}, {transform_indices = @transform_8, window_bounds = array<i64: 1, 8, 326>}, {transform_indices = @transform_9, window_bounds = array<i64: 1, 8, 2>}]} {
    %cst = arith.constant 0.000000e+00 : f32
    %0 = vector.broadcast %cst : f32 to vector<4x326xf32>
    %c0 = arith.constant 0 : index
    %c0_0 = arith.constant 0 : index
    %1 = vector.load %arg11[%c0, %c0_0] : memref<4x326xf32, #tpu.memory_space<vmem>>, vector<4x326xf32>
    tpu.vector_store %arg11[%c0, %c0_0], %0 {strides = array<i32>} : memref<4x326xf32, #tpu.memory_space<vmem>>, vector<4x326xf32>,
    %c0_1 = arith.constant 0 : index
    %c0_2 = arith.constant 0 : index
    %c0_3 = arith.constant 0 : index
    %2 = vector.load %arg1[%c0_1, %c0_2, %c0_3] : memref<1x4x256xf32, #tpu.memory_space<vmem>>, vector<1x4x16xf32>
    %3 = vector.shape_cast %2 : vector<1x4x16xf32> to vector<4x16xf32>
    %c0_4 = arith.constant 0 : index
    %c19 = arith.constant 19 : index
    %4 = vector.load %arg11[%c0_4, %c19] : memref<4x326xf32, #tpu.memory_space<vmem>>, vector<4x16xf32>
    tpu.vector_store %arg11[%c0_4, %c19], %3 {strides = array<i32>} : memref<4x326xf32, #tpu.memory_space<vmem>>, vector<4x16xf32>,
    %c0_5 = arith.constant 0 : index
    %c0_6 = arith.constant 0 : index
    %c16 = arith.constant 16 : index
    %5 = vector.load %arg1[%c0_5, %c0_6, %c16] : memref<1x4x256xf32, #tpu.memory_space<vmem>>, vector<1x4x16xf32>
    %6 = vector.shape_cast %5 : vector<1x4x16xf32> to vector<4x16xf32>
    %c0_7 = arith.constant 0 : index
    %c37 = arith.constant 37 : index
    %7 = vector.load %arg11[%c0_7, %c37] : memref<4x326xf32, #tpu.memory_space<vmem>>, vector<4x16xf32>
    tpu.vector_store %arg11[%c0_7, %c37], %6 {strides = array<i32>} : memref<4x326xf32, #tpu.memory_space<vmem>>, vector<4x16xf32>,
    %c0_8 = arith.constant 0 : index
    %c0_9 = arith.constant 0 : index
    %c32 = arith.constant 32 : index
    %8 = vector.load %arg1[%c0_8, %c0_9, %c32] : memref<1x4x256xf32, #tpu.memory_space<vmem>>, vector<1x4x16xf32>
    %9 = vector.shape_cast %8 : vector<1x4x16xf32> to vector<4x16xf32>
    %c0_10 = arith.constant 0 : index
    %c55 = arith.constant 55 : index
    %10 = vector.load %arg11[%c0_10, %c55] : memref<4x326xf32, #tpu.memory_space<vmem>>, vector<4x16xf32>
    tpu.vector_store %arg11[%c0_10, %c55], %9 {strides = array<i32>} : memref<4x326xf32, #tpu.memory_space<vmem>>, vector<4x16xf32>,
    %c0_11 = arith.constant 0 : index
    %c0_12 = arith.constant 0 : index
    %c48 = arith.constant 48 : index
    %11 = vector.load %arg1[%c0_11, %c0_12, %c48] : memref<1x4x256xf32, #tpu.memory_space<vmem>>, vector<1x4x16xf32>
    %12 = vector.shape_cast %11 : vector<1x4x16xf32> to vector<4x16xf32>
    %c0_13 = arith.constant 0 : index
    %c73 = arith.constant 73 : index
    %13 = vector.load %arg11[%c0_13, %c73] : memref<4x326xf32, #tpu.memory_space<vmem>>, vector<4x16xf32>
    tpu.vector_store %arg11[%c0_13, %c73], %12 {strides = array<i32>} : memref<4x326xf32, #tpu.memory_space<vmem>>, vector<4x16xf32>,
    %c0_14 = arith.constant 0 : index
    %c0_15 = arith.constant 0 : index
    %c64 = arith.constant 64 : index
    %14 = vector.load %arg1[%c0_14, %c0_15, %c64] : memref<1x4x256xf32, #tpu.memory_space<vmem>>, vector<1x4x16xf32>
    %15 = vector.shape_cast %14 : vector<1x4x16xf32> to vector<4x16xf32>
    %c0_16 = arith.constant 0 : index
    %c91 = arith.constant 91 : index
    %16 = vector.load %arg11[%c0_16, %c91] : memref<4x326xf32, #tpu.memory_space<vmem>>, vector<4x16xf32>
    tpu.vector_store %arg11[%c0_16, %c91], %15 {strides = array<i32>} : memref<4x326xf32, #tpu.memory_space<vmem>>, vector<4x16xf32>,
    %c0_17 = arith.constant 0 : index
    %c0_18 = arith.constant 0 : index
    %c80 = arith.constant 80 : index
    %17 = vector.load %arg1[%c0_17, %c0_18, %c80] : memref<1x4x256xf32, #tpu.memory_space<vmem>>, vector<1x4x16xf32>
    %18 = vector.shape_cast %17 : vector<1x4x16xf32> to vector<4x16xf32>
    %c0_19 = arith.constant 0 : index
    %c109 = arith.constant 109 : index
    %19 = vector.load %arg11[%c0_19, %c109] : memref<4x326xf32, #tpu.memory_space<vmem>>, vector<4x16xf32>
    tpu.vector_store %arg11[%c0_19, %c109], %18 {strides = array<i32>} : memref<4x326xf32, #tpu.memory_space<vmem>>, vector<4x16xf32>,
    %c0_20 = arith.constant 0 : index
    %c0_21 = arith.constant 0 : index
    %c96 = arith.constant 96 : index
    %20 = vector.load %arg1[%c0_20, %c0_21, %c96] : memref<1x4x256xf32, #tpu.memory_space<vmem>>, vector<1x4x16xf32>
    %21 = vector.shape_cast %20 : vector<1x4x16xf32> to vector<4x16xf32>
    %c0_22 = arith.constant 0 : index
    %c127 = arith.constant 127 : index
    %22 = vector.load %arg11[%c0_22, %c127] : memref<4x326xf32, #tpu.memory_space<vmem>>, vector<4x16xf32>
    tpu.vector_store %arg11[%c0_22, %c127], %21 {strides = array<i32>} : memref<4x326xf32, #tpu.memory_space<vmem>>, vector<4x16xf32>,
    %c0_23 = arith.constant 0 : index
    %c0_24 = arith.constant 0 : index
    %c112 = arith.constant 112 : index
    %23 = vector.load %arg1[%c0_23, %c0_24, %c112] : memref<1x4x256xf32, #tpu.memory_space<vmem>>, vector<1x4x16xf32>
    %24 = vector.shape_cast %23 : vector<1x4x16xf32> to vector<4x16xf32>
    %c0_25 = arith.constant 0 : index
    %c145 = arith.constant 145 : index
    %25 = vector.load %arg11[%c0_25, %c145] : memref<4x326xf32, #tpu.memory_space<vmem>>, vector<4x16xf32>
    tpu.vector_store %arg11[%c0_25, %c145], %24 {strides = array<i32>} : memref<4x326xf32, #tpu.memory_space<vmem>>, vector<4x16xf32>,
    %c0_26 = arith.constant 0 : index
    %c0_27 = arith.constant 0 : index
    %c128 = arith.constant 128 : index
    %26 = vector.load %arg1[%c0_26, %c0_27, %c128] : memref<1x4x256xf32, #tpu.memory_space<vmem>>, vector<1x4x16xf32>
    %27 = vector.shape_cast %26 : vector<1x4x16xf32> to vector<4x16xf32>
    %c0_28 = arith.constant 0 : index
    %c163 = arith.constant 163 : index
    %28 = vector.load %arg11[%c0_28, %c163] : memref<4x326xf32, #tpu.memory_space<vmem>>, vector<4x16xf32>
    tpu.vector_store %arg11[%c0_28, %c163], %27 {strides = array<i32>} : memref<4x326xf32, #tpu.memory_space<vmem>>, vector<4x16xf32>,
    %c0_29 = arith.constant 0 : index
    %c0_30 = arith.constant 0 : index
    %c144 = arith.constant 144 : index
    %29 = vector.load %arg1[%c0_29, %c0_30, %c144] : memref<1x4x256xf32, #tpu.memory_space<vmem>>, vector<1x4x16xf32>
    %30 = vector.shape_cast %29 : vector<1x4x16xf32> to vector<4x16xf32>
    %c0_31 = arith.constant 0 : index
    %c181 = arith.constant 181 : index
    %31 = vector.load %arg11[%c0_31, %c181] : memref<4x326xf32, #tpu.memory_space<vmem>>, vector<4x16xf32>
    tpu.vector_store %arg11[%c0_31, %c181], %30 {strides = array<i32>} : memref<4x326xf32, #tpu.memory_space<vmem>>, vector<4x16xf32>,
    %c0_32 = arith.constant 0 : index
    %c0_33 = arith.constant 0 : index
    %c160 = arith.constant 160 : index
    %32 = vector.load %arg1[%c0_32, %c0_33, %c160] : memref<1x4x256xf32, #tpu.memory_space<vmem>>, vector<1x4x16xf32>
    %33 = vector.shape_cast %32 : vector<1x4x16xf32> to vector<4x16xf32>
    %c0_34 = arith.constant 0 : index
    %c199 = arith.constant 199 : index
    %34 = vector.load %arg11[%c0_34, %c199] : memref<4x326xf32, #tpu.memory_space<vmem>>, vector<4x16xf32>
    tpu.vector_store %arg11[%c0_34, %c199], %33 {strides = array<i32>} : memref<4x326xf32, #tpu.memory_space<vmem>>, vector<4x16xf32>,
    %c0_35 = arith.constant 0 : index
    %c0_36 = arith.constant 0 : index
    %c176 = arith.constant 176 : index
    %35 = vector.load %arg1[%c0_35, %c0_36, %c176] : memref<1x4x256xf32, #tpu.memory_space<vmem>>, vector<1x4x16xf32>
    %36 = vector.shape_cast %35 : vector<1x4x16xf32> to vector<4x16xf32>
    %c0_37 = arith.constant 0 : index
    %c217 = arith.constant 217 : index
    %37 = vector.load %arg11[%c0_37, %c217] : memref<4x326xf32, #tpu.memory_space<vmem>>, vector<4x16xf32>
    tpu.vector_store %arg11[%c0_37, %c217], %36 {strides = array<i32>} : memref<4x326xf32, #tpu.memory_space<vmem>>, vector<4x16xf32>,
    %c0_38 = arith.constant 0 : index
    %c0_39 = arith.constant 0 : index
    %c192 = arith.constant 192 : index
    %38 = vector.load %arg1[%c0_38, %c0_39, %c192] : memref<1x4x256xf32, #tpu.memory_space<vmem>>, vector<1x4x16xf32>
    %39 = vector.shape_cast %38 : vector<1x4x16xf32> to vector<4x16xf32>
    %c0_40 = arith.constant 0 : index
    %c235 = arith.constant 235 : index
    %40 = vector.load %arg11[%c0_40, %c235] : memref<4x326xf32, #tpu.memory_space<vmem>>, vector<4x16xf32>
    tpu.vector_store %arg11[%c0_40, %c235], %39 {strides = array<i32>} : memref<4x326xf32, #tpu.memory_space<vmem>>, vector<4x16xf32>,
    %c0_41 = arith.constant 0 : index
    %c0_42 = arith.constant 0 : index
    %c208 = arith.constant 208 : index
    %41 = vector.load %arg1[%c0_41, %c0_42, %c208] : memref<1x4x256xf32, #tpu.memory_space<vmem>>, vector<1x4x16xf32>
    %42 = vector.shape_cast %41 : vector<1x4x16xf32> to vector<4x16xf32>
    %c0_43 = arith.constant 0 : index
    %c253 = arith.constant 253 : index
    %43 = vector.load %arg11[%c0_43, %c253] : memref<4x326xf32, #tpu.memory_space<vmem>>, vector<4x16xf32>
    tpu.vector_store %arg11[%c0_43, %c253], %42 {strides = array<i32>} : memref<4x326xf32, #tpu.memory_space<vmem>>, vector<4x16xf32>,
    %c0_44 = arith.constant 0 : index
    %c0_45 = arith.constant 0 : index
    %c224 = arith.constant 224 : index
    %44 = vector.load %arg1[%c0_44, %c0_45, %c224] : memref<1x4x256xf32, #tpu.memory_space<vmem>>, vector<1x4x16xf32>
    %45 = vector.shape_cast %44 : vector<1x4x16xf32> to vector<4x16xf32>
    %c0_46 = arith.constant 0 : index
    %c271 = arith.constant 271 : index
    %46 = vector.load %arg11[%c0_46, %c271] : memref<4x326xf32, #tpu.memory_space<vmem>>, vector<4x16xf32>
    tpu.vector_store %arg11[%c0_46, %c271], %45 {strides = array<i32>} : memref<4x326xf32, #tpu.memory_space<vmem>>, vector<4x16xf32>,
    %c0_47 = arith.constant 0 : index
    %c0_48 = arith.constant 0 : index
    %c240 = arith.constant 240 : index
    %47 = vector.load %arg1[%c0_47, %c0_48, %c240] : memref<1x4x256xf32, #tpu.memory_space<vmem>>, vector<1x4x16xf32>
    %48 = vector.shape_cast %47 : vector<1x4x16xf32> to vector<4x16xf32>
    %c0_49 = arith.constant 0 : index
    %c289 = arith.constant 289 : index
    %49 = vector.load %arg11[%c0_49, %c289] : memref<4x326xf32, #tpu.memory_space<vmem>>, vector<4x16xf32>
    tpu.vector_store %arg11[%c0_49, %c289], %48 {strides = array<i32>} : memref<4x326xf32, #tpu.memory_space<vmem>>, vector<4x16xf32>,
    %c0_50 = arith.constant 0 : index
    %c0_51 = arith.constant 0 : index
    %50 = vector.load %arg11[%c0_50, %c0_51] : memref<4x326xf32, #tpu.memory_space<vmem>>, vector<4x326xf32>
    %51 = arith.truncf %50 : vector<4x326xf32> to vector<4x326xbf16>
    %52 = vector.extract_strided_slice %51 {offsets = [0, 0], sizes = [4, 288], strides = [1, 1]} : vector<4x326xbf16> to vector<4x288xbf16>
    %53 = vector.extract_strided_slice %51 {offsets = [0, 1], sizes = [4, 288], strides = [1, 1]} : vector<4x326xbf16> to vector<4x288xbf16>
    %54 = vector.extract_strided_slice %51 {offsets = [0, 2], sizes = [4, 288], strides = [1, 1]} : vector<4x326xbf16> to vector<4x288xbf16>
    %55 = vector.extract_strided_slice %51 {offsets = [0, 18], sizes = [4, 288], strides = [1, 1]} : vector<4x326xbf16> to vector<4x288xbf16>
    %56 = vector.extract_strided_slice %51 {offsets = [0, 19], sizes = [4, 288], strides = [1, 1]} : vector<4x326xbf16> to vector<4x288xbf16>
    %57 = vector.extract_strided_slice %51 {offsets = [0, 20], sizes = [4, 288], strides = [1, 1]} : vector<4x326xbf16> to vector<4x288xbf16>
    %58 = vector.extract_strided_slice %51 {offsets = [0, 36], sizes = [4, 288], strides = [1, 1]} : vector<4x326xbf16> to vector<4x288xbf16>
    %59 = vector.extract_strided_slice %51 {offsets = [0, 37], sizes = [4, 288], strides = [1, 1]} : vector<4x326xbf16> to vector<4x288xbf16>
    %60 = vector.extract_strided_slice %51 {offsets = [0, 38], sizes = [4, 288], strides = [1, 1]} : vector<4x326xbf16> to vector<4x288xbf16>
    %61 = tpu.concatenate %52, %53, %54, %55, %56, %57, %58, %59, %60 in 0 : vector<4x288xbf16>, vector<4x288xbf16>, vector<4x288xbf16>, vector<4x288xbf16>, vector<4x288xbf16>, vector<4x288xbf16>, vector<4x288xbf16>, vector<4x288xbf16>, vector<4x288xbf16> -> vector<36x288xbf16>
    %c0_52 = arith.constant 0 : index
    %c0_53 = arith.constant 0 : index
    %62 = vector.load %arg2[%c0_52, %c0_53] : memref<8x36xbf16, #tpu.memory_space<vmem>>, vector<8x36xbf16>
    %cst_54 = arith.constant dense<0.000000e+00> : vector<8x288xf32>
    %63 = tpu.matmul %62, %61, %cst_54 {dimension_numbers = #tpu.dot_dimension_numbers<[1], [0], [0], [1], [0, 0, 1, 1], [], []>} : vector<8x36xbf16>, vector<36x288xbf16>, vector<8x288xf32> -> vector<8x288xf32>
    %c0_55 = arith.constant 0 : index
    %c0_56 = arith.constant 0 : index
    %64 = vector.load %arg3[%c0_55, %c0_56] : memref<8x1xf32, #tpu.memory_space<vmem>>, vector<8x1xf32>
    %65 = vector.broadcast %64 : vector<8x1xf32> to vector<8x288xf32>
    %66 = arith.addf %63, %65 : vector<8x288xf32>
    %cst_57 = arith.constant 0.000000e+00 : f32
    %67 = vector.broadcast %cst_57 : f32 to vector<8x288xf32>
    %68 = arith.maximumf %66, %67 : vector<8x288xf32>
    %c0_58 = arith.constant 0 : index
    %c0_59 = arith.constant 0 : index
    %69 = vector.load %arg8[%c0_58, %c0_59] : memref<288x1xf32, #tpu.memory_space<vmem>>, vector<288x1xf32>
    %cst_60 = arith.constant dense<0.000000e+00> : vector<8x1xf32>
    %70 = tpu.matmul %68, %69, %cst_60 {dimension_numbers = #tpu.dot_dimension_numbers<[1], [0], [0], [1], [0, 0, 1, 1], [], []>} : vector<8x288xf32>, vector<288x1xf32>, vector<8x1xf32> -> vector<8x1xf32>
    %71 = arith.mulf %68, %68 : vector<8x288xf32>
    %cst_61 = arith.constant dense<0.000000e+00> : vector<8x1xf32>
    %72 = tpu.matmul %71, %69, %cst_61 {dimension_numbers = #tpu.dot_dimension_numbers<[1], [0], [0], [1], [0, 0, 1, 1], [], []>} : vector<8x288xf32>, vector<288x1xf32>, vector<8x1xf32> -> vector<8x1xf32>
    %73 = tpu.concatenate %70, %72 in 1 : vector<8x1xf32>, vector<8x1xf32> -> vector<8x2xf32>
    %c0_62 = arith.constant 0 : index
    %c0_63 = arith.constant 0 : index
    %c0_64 = arith.constant 0 : index
    %74 = vector.load %arg10[%c0_62, %c0_63, %c0_64] : memref<1x8x2xf32, #tpu.memory_space<vmem>>, vector<1x8x2xf32>
    %75 = vector.shape_cast %74 : vector<1x8x2xf32> to vector<8x2xf32>
    %76 = vector.shape_cast %73 : vector<8x2xf32> to vector<1x8x2xf32>
    tpu.vector_store %arg10[%c0_62, %c0_63, %c0_64], %76 {strides = array<i32>} : memref<1x8x2xf32, #tpu.memory_space<vmem>>, vector<1x8x2xf32>,
    %c0_65 = arith.constant 0 : index
    %c0_66 = arith.constant 0 : index
    %77 = vector.load %arg7[%c0_65, %c0_66] : memref<1x288xf32, #tpu.memory_space<vmem>>, vector<1x288xf32>
    %78 = vector.broadcast %77 : vector<1x288xf32> to vector<8x288xf32>
    %79 = arith.mulf %68, %78 : vector<8x288xf32>
    %80 = arith.truncf %79 : vector<8x288xf32> to vector<8x288xbf16>
    %cst_67 = arith.constant 0.000000e+00 : bf16
    %81 = vector.broadcast %cst_67 : bf16 to vector<8x19xbf16>
    %c0_68 = arith.constant 0 : index
    %c0_69 = arith.constant 0 : index
    %c0_70 = arith.constant 0 : index
    %82 = vector.load %arg9[%c0_68, %c0_69, %c0_70] : memref<1x8x326xbf16, #tpu.memory_space<vmem>>, vector<1x8x19xbf16>
    %83 = vector.shape_cast %82 : vector<1x8x19xbf16> to vector<8x19xbf16>
    %84 = vector.shape_cast %81 : vector<8x19xbf16> to vector<1x8x19xbf16>
    tpu.vector_store %arg9[%c0_68, %c0_69, %c0_70], %84 {strides = array<i32>} : memref<1x8x326xbf16, #tpu.memory_space<vmem>>, vector<1x8x19xbf16>,
    %c0_71 = arith.constant 0 : index
    %c0_72 = arith.constant 0 : index
    %c19_73 = arith.constant 19 : index
    %85 = vector.load %arg9[%c0_71, %c0_72, %c19_73] : memref<1x8x326xbf16, #tpu.memory_space<vmem>>, vector<1x8x288xbf16>
    %86 = vector.shape_cast %85 : vector<1x8x288xbf16> to vector<8x288xbf16>
    %87 = vector.shape_cast %80 : vector<8x288xbf16> to vector<1x8x288xbf16>
    tpu.vector_store %arg9[%c0_71, %c0_72, %c19_73], %87 {strides = array<i32>} : memref<1x8x326xbf16, #tpu.memory_space<vmem>>, vector<1x8x288xbf16>,
    %cst_74 = arith.constant 0.000000e+00 : bf16
    %88 = vector.broadcast %cst_74 : bf16 to vector<8x19xbf16>
    %c0_75 = arith.constant 0 : index
    %c0_76 = arith.constant 0 : index
    %c307 = arith.constant 307 : index
    %89 = vector.load %arg9[%c0_75, %c0_76, %c307] : memref<1x8x326xbf16, #tpu.memory_space<vmem>>, vector<1x8x19xbf16>
    %90 = vector.shape_cast %89 : vector<1x8x19xbf16> to vector<8x19xbf16>
    %91 = vector.shape_cast %88 : vector<8x19xbf16> to vector<1x8x19xbf16>
    tpu.vector_store %arg9[%c0_75, %c0_76, %c307], %91 {strides = array<i32>} : memref<1x8x326xbf16, #tpu.memory_space<vmem>>, vector<1x8x19xbf16>,
    return
  }
  func.func @transform_0(%arg0: i32) -> (i32, i32, i32) {
    %c0_i32 = arith.constant 0 : i32
    %c0_i32_0 = arith.constant 0 : i32
    %c0_i32_1 = arith.constant 0 : i32
    return %arg0, %c0_i32, %c0_i32_0 : i32, i32, i32
  }
  func.func @transform_1(%arg0: i32) -> (i32, i32) {
    %c0_i32 = arith.constant 0 : i32
    %c0_i32_0 = arith.constant 0 : i32
    %c0_i32_1 = arith.constant 0 : i32
    return %c0_i32, %c0_i32_0 : i32, i32
  }
  func.func @transform_2(%arg0: i32) -> (i32, i32) {
    %c0_i32 = arith.constant 0 : i32
    %c0_i32_0 = arith.constant 0 : i32
    %c0_i32_1 = arith.constant 0 : i32
    return %c0_i32, %c0_i32_0 : i32, i32
  }
  func.func @transform_3(%arg0: i32) -> (i32, i32) {
    %c0_i32 = arith.constant 0 : i32
    %c0_i32_0 = arith.constant 0 : i32
    %c0_i32_1 = arith.constant 0 : i32
    return %c0_i32, %c0_i32_0 : i32, i32
  }
  func.func @transform_4(%arg0: i32) -> (i32, i32) {
    %c0_i32 = arith.constant 0 : i32
    %c0_i32_0 = arith.constant 0 : i32
    %c0_i32_1 = arith.constant 0 : i32
    return %c0_i32, %c0_i32_0 : i32, i32
  }
  func.func @transform_5(%arg0: i32) -> (i32, i32) {
    %c0_i32 = arith.constant 0 : i32
    %c0_i32_0 = arith.constant 0 : i32
    %c0_i32_1 = arith.constant 0 : i32
    return %c0_i32, %c0_i32_0 : i32, i32
  }
  func.func @transform_6(%arg0: i32) -> (i32, i32) {
    %c0_i32 = arith.constant 0 : i32
    %c0_i32_0 = arith.constant 0 : i32
    %c0_i32_1 = arith.constant 0 : i32
    return %c0_i32, %c0_i32_0 : i32, i32
  }
  func.func @transform_7(%arg0: i32) -> (i32, i32) {
    %c0_i32 = arith.constant 0 : i32
    %c0_i32_0 = arith.constant 0 : i32
    %c0_i32_1 = arith.constant 0 : i32
    return %c0_i32, %c0_i32_0 : i32, i32
  }
  func.func @transform_8(%arg0: i32) -> (i32, i32, i32) {
    %c0_i32 = arith.constant 0 : i32
    %c0_i32_0 = arith.constant 0 : i32
    %c0_i32_1 = arith.constant 0 : i32
    return %arg0, %c0_i32, %c0_i32_0 : i32, i32, i32
  }
  func.func @transform_9(%arg0: i32) -> (i32, i32, i32) {
    %c0_i32 = arith.constant 0 : i32
    %c0_i32_0 = arith.constant 0 : i32
    %c0_i32_1 = arith.constant 0 : i32
    return %arg0, %c0_i32, %c0_i32_0 : i32, i32, i32
  }
}

module attributes {stable_mosaic.version = 11 : i64} {
  func.func @_bn_crop_kernel(%arg0: i32, %arg1: memref<1x8x288xbf16, #tpu.memory_space<vmem>>, %arg2: memref<8x1xf32, #tpu.memory_space<vmem>>, %arg3: memref<8x1xf32, #tpu.memory_space<vmem>>, %arg4: memref<1x8x256xf32, #tpu.memory_space<vmem>>) attributes {dimension_semantics = [#tpu.dimension_semantics<parallel>], iteration_bounds = array<i64: 2>, scalar_prefetch = 0 : i64, scratch_operands = 0 : i64, tpu.core_type = #tpu.core_type<tc>, window_params = [{transform_indices = @transform_0, window_bounds = array<i64: 1, 8, 288>}, {pipeline_mode = #tpu.pipeline_mode<synchronous>, transform_indices = @transform_1, window_bounds = array<i64: 8, 1>}, {pipeline_mode = #tpu.pipeline_mode<synchronous>, transform_indices = @transform_2, window_bounds = array<i64: 8, 1>}, {transform_indices = @transform_3, window_bounds = array<i64: 1, 8, 256>}]} {
    %c0 = arith.constant 0 : index
    %c0_0 = arith.constant 0 : index
    %c0_1 = arith.constant 0 : index
    %0 = vector.load %arg1[%c0, %c0_0, %c0_1] : memref<1x8x288xbf16, #tpu.memory_space<vmem>>, vector<1x8x16xbf16>
    %1 = vector.shape_cast %0 : vector<1x8x16xbf16> to vector<8x16xbf16>
    %c0_2 = arith.constant 0 : index
    %c0_3 = arith.constant 0 : index
    %c18 = arith.constant 18 : index
    %2 = vector.load %arg1[%c0_2, %c0_3, %c18] : memref<1x8x288xbf16, #tpu.memory_space<vmem>>, vector<1x8x16xbf16>
    %3 = vector.shape_cast %2 : vector<1x8x16xbf16> to vector<8x16xbf16>
    %c0_4 = arith.constant 0 : index
    %c0_5 = arith.constant 0 : index
    %c36 = arith.constant 36 : index
    %4 = vector.load %arg1[%c0_4, %c0_5, %c36] : memref<1x8x288xbf16, #tpu.memory_space<vmem>>, vector<1x8x16xbf16>
    %5 = vector.shape_cast %4 : vector<1x8x16xbf16> to vector<8x16xbf16>
    %c0_6 = arith.constant 0 : index
    %c0_7 = arith.constant 0 : index
    %c54 = arith.constant 54 : index
    %6 = vector.load %arg1[%c0_6, %c0_7, %c54] : memref<1x8x288xbf16, #tpu.memory_space<vmem>>, vector<1x8x16xbf16>
    %7 = vector.shape_cast %6 : vector<1x8x16xbf16> to vector<8x16xbf16>
    %c0_8 = arith.constant 0 : index
    %c0_9 = arith.constant 0 : index
    %c72 = arith.constant 72 : index
    %8 = vector.load %arg1[%c0_8, %c0_9, %c72] : memref<1x8x288xbf16, #tpu.memory_space<vmem>>, vector<1x8x16xbf16>
    %9 = vector.shape_cast %8 : vector<1x8x16xbf16> to vector<8x16xbf16>
    %c0_10 = arith.constant 0 : index
    %c0_11 = arith.constant 0 : index
    %c90 = arith.constant 90 : index
    %10 = vector.load %arg1[%c0_10, %c0_11, %c90] : memref<1x8x288xbf16, #tpu.memory_space<vmem>>, vector<1x8x16xbf16>
    %11 = vector.shape_cast %10 : vector<1x8x16xbf16> to vector<8x16xbf16>
    %c0_12 = arith.constant 0 : index
    %c0_13 = arith.constant 0 : index
    %c108 = arith.constant 108 : index
    %12 = vector.load %arg1[%c0_12, %c0_13, %c108] : memref<1x8x288xbf16, #tpu.memory_space<vmem>>, vector<1x8x16xbf16>
    %13 = vector.shape_cast %12 : vector<1x8x16xbf16> to vector<8x16xbf16>
    %c0_14 = arith.constant 0 : index
    %c0_15 = arith.constant 0 : index
    %c126 = arith.constant 126 : index
    %14 = vector.load %arg1[%c0_14, %c0_15, %c126] : memref<1x8x288xbf16, #tpu.memory_space<vmem>>, vector<1x8x16xbf16>
    %15 = vector.shape_cast %14 : vector<1x8x16xbf16> to vector<8x16xbf16>
    %c0_16 = arith.constant 0 : index
    %c0_17 = arith.constant 0 : index
    %c144 = arith.constant 144 : index
    %16 = vector.load %arg1[%c0_16, %c0_17, %c144] : memref<1x8x288xbf16, #tpu.memory_space<vmem>>, vector<1x8x16xbf16>
    %17 = vector.shape_cast %16 : vector<1x8x16xbf16> to vector<8x16xbf16>
    %c0_18 = arith.constant 0 : index
    %c0_19 = arith.constant 0 : index
    %c162 = arith.constant 162 : index
    %18 = vector.load %arg1[%c0_18, %c0_19, %c162] : memref<1x8x288xbf16, #tpu.memory_space<vmem>>, vector<1x8x16xbf16>
    %19 = vector.shape_cast %18 : vector<1x8x16xbf16> to vector<8x16xbf16>
    %c0_20 = arith.constant 0 : index
    %c0_21 = arith.constant 0 : index
    %c180 = arith.constant 180 : index
    %20 = vector.load %arg1[%c0_20, %c0_21, %c180] : memref<1x8x288xbf16, #tpu.memory_space<vmem>>, vector<1x8x16xbf16>
    %21 = vector.shape_cast %20 : vector<1x8x16xbf16> to vector<8x16xbf16>
    %c0_22 = arith.constant 0 : index
    %c0_23 = arith.constant 0 : index
    %c198 = arith.constant 198 : index
    %22 = vector.load %arg1[%c0_22, %c0_23, %c198] : memref<1x8x288xbf16, #tpu.memory_space<vmem>>, vector<1x8x16xbf16>
    %23 = vector.shape_cast %22 : vector<1x8x16xbf16> to vector<8x16xbf16>
    %c0_24 = arith.constant 0 : index
    %c0_25 = arith.constant 0 : index
    %c216 = arith.constant 216 : index
    %24 = vector.load %arg1[%c0_24, %c0_25, %c216] : memref<1x8x288xbf16, #tpu.memory_space<vmem>>, vector<1x8x16xbf16>
    %25 = vector.shape_cast %24 : vector<1x8x16xbf16> to vector<8x16xbf16>
    %c0_26 = arith.constant 0 : index
    %c0_27 = arith.constant 0 : index
    %c234 = arith.constant 234 : index
    %26 = vector.load %arg1[%c0_26, %c0_27, %c234] : memref<1x8x288xbf16, #tpu.memory_space<vmem>>, vector<1x8x16xbf16>
    %27 = vector.shape_cast %26 : vector<1x8x16xbf16> to vector<8x16xbf16>
    %c0_28 = arith.constant 0 : index
    %c0_29 = arith.constant 0 : index
    %c252 = arith.constant 252 : index
    %28 = vector.load %arg1[%c0_28, %c0_29, %c252] : memref<1x8x288xbf16, #tpu.memory_space<vmem>>, vector<1x8x16xbf16>
    %29 = vector.shape_cast %28 : vector<1x8x16xbf16> to vector<8x16xbf16>
    %c0_30 = arith.constant 0 : index
    %c0_31 = arith.constant 0 : index
    %c270 = arith.constant 270 : index
    %30 = vector.load %arg1[%c0_30, %c0_31, %c270] : memref<1x8x288xbf16, #tpu.memory_space<vmem>>, vector<1x8x16xbf16>
    %31 = vector.shape_cast %30 : vector<1x8x16xbf16> to vector<8x16xbf16>
    %32 = tpu.concatenate %1, %3, %5, %7, %9, %11, %13, %15, %17, %19, %21, %23, %25, %27, %29, %31 in 1 : vector<8x16xbf16>, vector<8x16xbf16>, vector<8x16xbf16>, vector<8x16xbf16>, vector<8x16xbf16>, vector<8x16xbf16>, vector<8x16xbf16>, vector<8x16xbf16>, vector<8x16xbf16>, vector<8x16xbf16>, vector<8x16xbf16>, vector<8x16xbf16>, vector<8x16xbf16>, vector<8x16xbf16>, vector<8x16xbf16>, vector<8x16xbf16> -> vector<8x256xbf16>
    %33 = arith.extf %32 : vector<8x256xbf16> to vector<8x256xf32>
    %c0_32 = arith.constant 0 : index
    %c0_33 = arith.constant 0 : index
    %34 = vector.load %arg2[%c0_32, %c0_33] : memref<8x1xf32, #tpu.memory_space<vmem>>, vector<8x1xf32>
    %35 = vector.broadcast %34 : vector<8x1xf32> to vector<8x256xf32>
    %36 = arith.mulf %33, %35 : vector<8x256xf32>
    %c0_34 = arith.constant 0 : index
    %c0_35 = arith.constant 0 : index
    %37 = vector.load %arg3[%c0_34, %c0_35] : memref<8x1xf32, #tpu.memory_space<vmem>>, vector<8x1xf32>
    %38 = vector.broadcast %37 : vector<8x1xf32> to vector<8x256xf32>
    %39 = arith.addf %36, %38 : vector<8x256xf32>
    %c0_36 = arith.constant 0 : index
    %c0_37 = arith.constant 0 : index
    %c0_38 = arith.constant 0 : index
    %40 = vector.load %arg4[%c0_36, %c0_37, %c0_38] : memref<1x8x256xf32, #tpu.memory_space<vmem>>, vector<1x8x256xf32>
    %41 = vector.shape_cast %40 : vector<1x8x256xf32> to vector<8x256xf32>
    %42 = vector.shape_cast %39 : vector<8x256xf32> to vector<1x8x256xf32>
    tpu.vector_store %arg4[%c0_36, %c0_37, %c0_38], %42 {strides = array<i32>} : memref<1x8x256xf32, #tpu.memory_space<vmem>>, vector<1x8x256xf32>,
    return
  }
  func.func @transform_0(%arg0: i32) -> (i32, i32, i32) {
    %c0_i32 = arith.constant 0 : i32
    %c0_i32_0 = arith.constant 0 : i32
    %c0_i32_1 = arith.constant 0 : i32
    return %arg0, %c0_i32, %c0_i32_0 : i32, i32, i32
  }
  func.func @transform_1(%arg0: i32) -> (i32, i32) {
    %c0_i32 = arith.constant 0 : i32
    %c0_i32_0 = arith.constant 0 : i32
    %c0_i32_1 = arith.constant 0 : i32
    return %c0_i32, %c0_i32_0 : i32, i32
  }
  func.func @transform_2(%arg0: i32) -> (i32, i32) {
    %c0_i32 = arith.constant 0 : i32
    %c0_i32_0 = arith.constant 0 : i32
    %c0_i32_1 = arith.constant 0 : i32
    return %c0_i32, %c0_i32_0 : i32, i32
  }
  func.func @transform_3(%arg0: i32) -> (i32, i32, i32) {
    %c0_i32 = arith.constant 0 : i32
    %c0_i32_0 = arith.constant 0 : i32
    %c0_i32_1 = arith.constant 0 : i32
    return %arg0, %c0_i32, %c0_i32_0 : i32, i32, i32
  }
}

</mosaic_0001>

<bundles_post_ra>
// kernel: unet_conv_block.5
= control target key start
LH: loop header
LB: loop body
LE: loop exit
PB: predicated region body
PF: predicated region fallthrough
CT: control target
= control target key end

     0   :  { %s443_s12 = smov 0   ;;  %s490_s0 = inlined_call_operand.vmem [shape: bf16[2,8,288], index: 0, kind: input, shape index: {}]   ;;  %s491_s1 = inlined_call_operand.vmem [shape: f32[8,1], index: 1, kind: input, shape index: {}]   ;;  %s492_s2 = inlined_call_operand.vmem [shape: f32[8,1], index: 2, kind: input, shape index: {}]   ;;  %s493_s3 = inlined_call_operand.vmem [shape: f32[2,8,256], index: 3, kind: output, shape index: {}]  }
   0x1 LB: > { %s347_s13 = sadd.s32 4294967295, %s405_s12   ;;  %p351_p0 = scmp.ge.s32.totalorder %s405_s12, 1  ;;  %s405_s12 = sphi %s443_s12, %s13_s12  }
   0x2   : > { %p137_p1 = scmp.lt.s32.totalorder %s405_s12, 3 }
   0x4   : > { %p138_p2 = pnand %p351_p0, %p137_p1 }
   0x5   : > { %p161_p3 = scmp.lt.s32.totalorder (!%p138_p2), %s347_s13, 1  ;;  %s408_s18 = smov (!%p138_p2), 110  }
   0x6   : > { %141 = sbr.rel (%p138_p2) target bundleno = 181 (0xb5), region = 32  ;;  %s409_s19 = smov (!%p138_p2), 126  }
   0x7   : > { %s410_s20 = smov (!%p138_p2), 124   ;;  %s411_s21 = smov (!%p138_p2), 112  }
   0x8   : > { %s412_s22 = smov (!%p138_p2), 122   ;;  %s413_s23 = smov (!%p138_p2), 108  }
   0x9   : > { %s414_s24 = smov (!%p138_p2), 120   ;;  %s415_s25 = smov (!%p138_p2), 106  }
   0xa   : > { %s416_s26 = smov (!%p138_p2), 118   ;;  %s417_s27 = smov (!%p138_p2), 104  }
   0xb   : > { %v407_v0 = vmov 0   ;;  %s495_s13 = smov (!%p161_p3, %s347_s13), 1  ;;  %s418_s28 = smov 100   ;;  %v274_v6 = vld [vmem:[%s491_s1] sm:$0xff]  ;;  %vm233_vm0 = vcmask 130048   ;;  %vm237_vm1 = vcmask 261120  }
   0xc   : > { %390 = vset.pattern.permute.xlu1 %v407_v0  ;;  %391 = vset.pattern.permute.xlu0 %v407_v0  ;;  %s365_s14 = smul.u32 12, %s495_s13  ;;  %s419_s29 = smov 102   ;;  %v282_v12 = vld [vmem:[%s492_s2] sm:$0xff]  ;;  %vm240_vm2 = vcmask 392192   ;;  %vm243_vm3 = vcmask 523264   ;;  %vm246_vm4 = vcmask 654336  }
   0xd   : > { %s420_s5 = smov 114   ;;  %s421_s6 = smov 116   ;;  %vm226_vm5 = vcmask 818176   ;;  %vm200_vm6 = vcmask 932864   ;;  %vm252_vm7 = vcmask 916480   ;;  %vm249_vm8 = vcmask 785408  }
   0xe   : > { %s457_s17 = scalar_lea.vmem %s490_s0, %s365_s14  ;;  %s422_s7 = smov 98  }
   0xf   : > { %v392_v1 = vld [vmem:[%s457_s17 + $0x4] ss:$0 sps:$4 sm:$0xff]   ;;  %v461_v2 = vld [vmem:[%s457_s17] sm:$0xf]  ;;  %v398_v10 = vld [vmem:[%s457_s17 + $0x8] ss:$0 sps:$4 sm:$0xff]  }
  0x10   : > { %v355_v3 = vcombine.low %v461_v2, %v461_v2  ;;  %207 = vrot.lane.b32.xlu1 %v392_v1, %s408_s18  ;;  %v174_v4 = vld [vmem:[%s457_s17 + $0x4] sm:$0xff]  ;;  %s364_s10 = sshll.u32 %s495_s13, 4 }
  0x11   : > { %v359_v5 = vcombine.low %v174_v4, %v174_v4  ;;  %v360_v7 = vcombine.high %v174_v4, %v174_v4  ;;  %v172_v8 = vld [vmem:[%s457_s17] sm:$0xff]  ;;  %s170_s15 = scalar_lea.vmem %s493_s3, %s364_s10 }
  0x12   : > { %179 = vrot.lane.b32.xlu0 %v355_v3, %s409_s19  ;;  %v356_v9 = vcombine.low %v172_v8, %v172_v8  ;;  %v357_v11 = vcombine.high %v172_v8, %v172_v8 }
  0x14   : > { %181 = vrot.lane.b32.xlu1 %v355_v3, %s410_s20 }
  0x16   : > { %205 = vrot.lane.b32.xlu0 %v392_v1, %s411_s21 }
  0x18   : > { %183 = vrot.lane.b32.xlu1 %v355_v3, %s412_s22 }
  0x1a   : > { %209 = vrot.lane.b32.xlu0 %v392_v1, %s413_s23 }
  0x1c   : > { %185 = vrot.lane.b32.xlu1 %v355_v3, %s414_s24 }
  0x1e   : > { %211 = vrot.lane.b32.xlu0 %v392_v1, %s415_s25 }
  0x20   : > { %187 = vrot.lane.b32.xlu1 %v355_v3, %s416_s26 }
  0x22   : > { %213 = vrot.lane.b32.xlu0 %v392_v1, %s417_s27 }
  0x24   : > { %222 = vrot.lane.b32.xlu1 %v359_v5, %s418_s28 }
  0x26   : > { %215 = vrot.lane.b32.xlu0 %v392_v1, %s419_s29 }
  0x28   : > { %277 = vperm.xlu1 %390, %v274_v6  }
  0x2a   : > { %224 = vrot.lane.b32.xlu0 %v360_v7, %s418_s28 }
  0x2c   : > { %196 = vrot.lane.b32.xlu1 %v356_v9, %s420_s5 }
  0x2e   : > { %189 = vrot.lane.b32.xlu0 %v355_v3, %s421_s6 }
  0x30   : > { %231 = vrot.lane.b32.xlu1 %v398_v10, %s422_s7 }
  0x32   : > { %198 = vrot.lane.b32.xlu0 %v357_v11, %s420_s5 }
  0x36   : > { %285 = vperm.xlu0 %391, %v282_v12  }
  0x82   : > { %v208_v13 = vpop.permute.xlu1 %207 }
  0x84   : > { %v180_v14 = vpop.permute.xlu0 %179 }
  0x85   : > { %v236_v27 = vsel %vm233_vm0, %v461_v2, %v180_v14 }
  0x86   : > { %v182_v15 = vpop.permute.xlu1 %181 }
  0x87   : > { %v239_v29 = vsel %vm237_vm1, %v236_v27, %v182_v15 }
  0x88   : > { %v206_v16 = vpop.permute.xlu0 %205 }
  0x89   : > { %v258_v31 = vsel %vm233_vm0, %v206_v16, %v208_v13 }
  0x8a   : > { %v184_v18 = vpop.permute.xlu1 %183 }
  0x8b   : > { %v242_v30 = vsel %vm240_vm2, %v239_v29, %v184_v18 }
  0x8c   : > { %v210_v17 = vpop.permute.xlu0 %209 }
  0x8d   : > { %v260_v33 = vsel %vm237_vm1, %v258_v31, %v210_v17 }
  0x8e   : > { %v186_v20 = vpop.permute.xlu1 %185 }
  0x8f   : > { %v245_v32 = vsel %vm243_vm3, %v242_v30, %v186_v20 }
  0x90   : > { %v212_v19 = vpop.permute.xlu0 %211 }
  0x91   : > { %v262_v37 = vsel %vm240_vm2, %v260_v33, %v212_v19 }
  0x92   : > { %v188_v23 = vpop.permute.xlu1 %187 }
  0x93   : > { %v248_v34 = vsel %vm246_vm4, %v245_v32, %v188_v23 }
  0x94   : > { %v214_v21 = vpop.permute.xlu0 %213 }
  0x95   : > { %v264_v41 = vsel %vm243_vm3, %v262_v37, %v214_v21 }
  0x96   : > { %v223_v25 = vpop.permute.xlu1 %222 }
  0x98   : > { %v216_v22 = vpop.permute.xlu0 %215 }
  0x99   : > { %v266_v43 = vsel %vm246_vm4, %v264_v41, %v216_v22 }
  0x9c   : > { %v225_v24 = vpop.permute.xlu0 %224 }
  0x9d   : > { %v227_v38 = vsel %vm226_vm5, %v223_v25, %v225_v24 }
  0x9e   : > { %v268_v46 = vsel %vm249_vm8, %v266_v43, %v227_v38 }
  0xa0   : > { %v190_v26 = vpop.permute.xlu0 %189 }
  0xa1   : > { %v251_v39 = vsel %vm249_vm8, %v248_v34, %v190_v26 }
  0xa3   : > { %v278_v28 = vpop.permute.xlu1 %277 }
  0xa4   : > { %v199_v35 = vpop.permute.xlu0 %198 }
  0xa7   : > { %v197_v36 = vpop.permute.xlu1 %196 }
  0xa8   : > { %v201_v40 = vsel %vm200_vm6, %v197_v36, %v199_v35 }
  0xa9   : > { %v254_v42 = vsel %vm252_vm7, %v251_v39, %v201_v40 }
  0xaa   : > { %v272_v44 = vunpack.c.l.bf16 %v254_v42 }
  0xab   : > { %v232_v45 = vpop.permute.xlu1 %231 }
  0xac   : > { %v270_v47 = vsel %vm252_vm7, %v268_v46, %v232_v45  ;;  %v280_v49 = vmul.f32 %v278_v28, %v272_v44 }
  0xad   : > { %v273_v48 = vunpack.c.l.bf16 %v270_v47 }
  0xaf   : > { %v281_v50 = vmul.f32 %v278_v28, %v273_v48 }
  0xb1   : > { %v286_v51 = vpop.permute.xlu0 %285 }
  0xb2   : > { %v288_v52 = vadd.f32 %v286_v51, %v280_v49  ;;  %v289_v53 = vadd.f32 %v286_v51, %v281_v50 }
  0xb4   : > { %290 = vst [vmem:[%s170_s15] sm:$0xff] %v288_v52  ;;  %291 = vst [vmem:[%s170_s15 + $0x8] sm:$0xff] %v289_v53 }
  0xb5 PF: > { %s13_s12 = sadd.s32 1, %s405_s12  }
  0xb6   : > { %p10_p4 = scmp.ge.s32.totalorder %s13_s12, 4  }
  0xb8   :  { %12 = sbr.rel (!%p10_p4) target bundleno = 1 (0x1), region = 62 }

// kernel: unet_conv_block.4
= control target key start
LH: loop header
LB: loop body
LE: loop exit
PB: predicated region body
PF: predicated region fallthrough
CT: control target
= control target key end

     0   :  { %s1291_s30 = smov 0   ;;  %s1588_s0 = inlined_call_operand.vmem [shape: bf16[2,8,326], index: 0, kind: input, shape index: {}]   ;;  %s1589_s1 = inlined_call_operand.vmem [shape: bf16[8,72], index: 1, kind: input, shape index: {}]   ;;  %s1590_s2 = inlined_call_operand.vmem [shape: f32[8,1], index: 2, kind: input, shape index: {}]   ;;  %s1591_s3 = inlined_call_operand.vmem [shape: f32[8,1], index: 3, kind: input, shape index: {}]   ;;  %s1592_s4 = inlined_call_operand.vmem [shape: f32[8,1], index: 4, kind: input, shape index: {}]   ;;  %s1593_s5 = inlined_call_operand.vmem [shape: f32[1,326], index: 5, kind: input, shape index: {}]   ;;  %s1594_s6 = inlined_call_operand.vmem [shape: f32[1,288], index: 6, kind: input, shape index: {}]   ;;  %s1595_s7 = inlined_call_operand.vmem [shape: f32[288,1], index: 7, kind: input, shape index: {}]   ;;  %s1596_s8 = inlined_call_operand.vmem [shape: bf16[2,8,288], index: 8, kind: output, shape index: {0}]   ;;  %s1597_s9 = inlined_call_operand.vmem [shape: f32[2,8,2], index: 9, kind: output, shape index: {1}]  }
   0x1 LB: > { %s1058_s6 = sadd.s32 4294967295, %s1227_s30   ;;  %p1062_p0 = scmp.ge.s32.totalorder %s1227_s30, 1  ;;  %s1227_s30 = sphi %s1291_s30, %s20_s30  }
   0x2   : > { %p290_p1 = scmp.lt.s32.totalorder %s1227_s30, 3 }
   0x4   : > { %p291_p2 = pnand %p1062_p0, %p290_p1 }
   0x5   : > { %p330_p3 = scmp.lt.s32.totalorder (!%p291_p2), %s1058_s6, 1  ;;  %s1231_s20 = smov (!%p291_p2), 90  }
   0x6   : > { %294 = sbr.rel (%p291_p2) target bundleno = 835 (0x343), region = 52  ;;  %s1232_s21 = smov (!%p291_p2), 92  }
   0x7   : > { %s1233_s22 = smov (!%p291_p2), 91   ;;  %s1234_s23 = smov (!%p291_p2), 109  }
   0x8   : > { %s1235_s24 = smov (!%p291_p2), 108   ;;  %s1237_s25 = smov (!%p291_p2), 126  }
   0x9   : > { %s1238_s26 = smov (!%p291_p2), 110   ;;  %s1239_s27 = smov (!%p291_p2), 127  }
   0xb   : > { %v350_v0 = vld [vmem:[%s1591_s3] sm:$0xff]  ;;  %v1229_v1 = vmov 0   ;;  %s1599_s6 = smov (!%p330_p3, %s1058_s6), 1  ;;  %v367_v3 = vlaneseq  ;;  %v1230_v10 = vmov 0.0   ;;  %vm1236_vm0 = vmmov 0   ;;  %v1362_v57 = vld [vmem:[%s1595_s7 + $0x118] sm:$0xff] }
   0xc   : > { %1220 = vset.pattern.permute.xlu0 %v1229_v1  ;;  %570 = vmatprep.mubr.bf16.mxu0 %v1229_v1  ;;  %v359_v2 = vld [vmem:[%s1592_s4] sm:$0xff]  ;;  %s1199_s14 = smul.u32 12, %s1599_s6  ;;  %vm469_vm1 = vcmask 1043456   ;;  %vm466_vm2 = vcmask 736256   ;;  %vm448_vm3 = vcmask 752640   ;;  %vm457_vm4 = vcmask 744448  }
   0xd   : > { %353 = vperm.xlu0 %1220, %v350_v0   ;;  %v368_v4 = vshrl.u32 %v367_v3, 7  ;;  %v360_v9 = vld [vmem:[%s1593_s5] sm:$0x7]  ;;  %1163 = vmatprep.subr.bf16.mxu1 %v1230_v10  ;;  %vm525_vm5 = vcmask 588800   ;;  %vm430_vm6 = vcmask 891904   ;;  %vm439_vm7 = vcmask 883712  }
   0xe   : > { %s334_s17 = scalar_lea.vmem %s1588_s0, %s1199_s14  ;;  %1173 = vmatprep.mubr.msk.bf16.mxu1 %vm1236_vm0, %v1230_v10  ;;  %v519_v35 = vld [vmem:[%s1590_s2] sm:$0xff]  ;;  %vm412_vm8 = vcmask 1031168   ;;  %vm421_vm9 = vcmask 900096   ;;  %vm403_vm10 = vcmask 1039360   ;;  %vm658_vm11 = vcmask 261120   ;;  %s1551_s10 = scalar_lea.vmem %s1596_s8, %s1199_s14 }
   0xf   : > { %v369_v5 = vsub.s32 0, %v368_v4  ;;  %v377_v6 = vsub.s32 2, %v368_v4  ;;  %v345_v7 = vld [vmem:[%s334_s17] sm:$0xff]  ;;  %v346_v8 = vld [vmem:[%s334_s17 + $0x8] sm:$0xf]  ;;  %v373_v23 = vsub.s32 1, %v368_v4 }
  0x10   : > { %v347_v12 = vunpack.c.l.bf16 %v345_v7  ;;  %v349_v13 = vunpack.c.l.bf16 %v346_v8  ;;  %v348_v28 = vunpack.c.h.bf16 %v345_v7  ;;  %v518_v56 = vld [vmem:[%s1589_s1] sm:$0xf]  ;;  %vm970_vm12 = vcmask 257024   ;;  %s1240_s14 = smov 1   ;;  %s1065_s11 = sshll.u32 %s1599_s6, 3 }
  0x11   : > { %363 = vperm.xlu0 %1220, %v359_v2   ;;  %v370_v14 = vrot.slane %v360_v9, %v369_v5  ;;  %v378_v15 = vrot.slane %v360_v9, %v377_v6  ;;  %v374_v26 = vrot.slane %v360_v9, %v373_v23  ;;  %vm952_vm13 = vcmask 7168   ;;  %s343_s15 = scalar_lea.vmem %s1597_s9, %s1065_s11 }
  0x12   : > { %vm954_vm14 = vcmask 15360  }
  0x88   : > { %v354_v11 = vpop.permute.xlu0 %353 }
  0x89   : > { %v356_v17 = vmul.f32 %v354_v11, %v347_v12  ;;  %v358_v18 = vmul.f32 %v354_v11, %v349_v13  ;;  %v357_v30 = vmul.f32 %v354_v11, %v348_v28 }
  0x8c   : > { %v364_v16 = vpop.permute.xlu0 %363 }
  0x8d   : > { %v382_v19 = vmul.f32 %v370_v14, %v364_v16  ;;  %v384_v20 = vmul.f32 %v378_v15, %v364_v16  ;;  %v383_v29 = vmul.f32 %v374_v26, %v364_v16 }
  0x8f   : > { %v385_v21 = vadd.f32 %v382_v19, %v356_v17  ;;  %v387_v22 = vadd.f32 %v384_v20, %v358_v18  ;;  %v386_v31 = vadd.f32 %v383_v29, %v357_v30  ;;  %v1387_v30 = vld [vmem:[%s1595_s7 + $0x110] sm:$0xff] }
  0x91   : > { %v1317_v24 = vpack.c.bf16 %v385_v21, %v385_v21  ;;  %v1319_v25 = vpack.c.bf16 %v387_v22, %v387_v22  ;;  %v1329_v32 = vpack.c.bf16 %v386_v31, %v386_v31  ;;  %v1394_v31 = vld [vmem:[%s1595_s7 + $0x108] sm:$0xff] }
  0x93   : > { %464 = vrot.lane.b32.xlu1 %v1319_v25, %s1231_s20  ;;  %460 = vrot.lane.b32.xlu0 %v1317_v24, %s1231_s20  ;;  %v396_v27 = vrot.slane %v1319_v25, 4  ;;  %v395_v33 = vrot.slane %v1329_v32, 4  ;;  %v394_v34 = vrot.slane %v1317_v24, 4 }
  0x97   : > { %446 = vrot.lane.b32.xlu1 %v1319_v25, %s1232_s21  ;;  %455 = vrot.lane.b32.xlu0 %v396_v27, %s1233_s22 }
  0x9b   : > { %428 = vrot.lane.b32.xlu1 %v1319_v25, %s1234_s23  ;;  %437 = vrot.lane.b32.xlu0 %v396_v27, %s1235_s24 }
  0x9f   : > { %410 = vrot.lane.b32.xlu1 %v1319_v25, %s1237_s25  ;;  %419 = vrot.lane.b32.xlu0 %v396_v27, %s1238_s26 }
  0xa3   : > { %462 = vrot.lane.b32.xlu1 %v1329_v32, %s1231_s20  ;;  %444 = vrot.lane.b32.xlu0 %v1329_v32, %s1232_s21 }
  0xa7   : > { %401 = vrot.lane.b32.xlu1 %v396_v27, %s1239_s27  ;;  %442 = vrot.lane.b32.xlu0 %v1317_v24, %s1232_s21 }
  0xab   : > { %453 = vrot.lane.b32.xlu1 %v395_v33, %s1233_s22  ;;  %426 = vrot.lane.b32.xlu0 %v1329_v32, %s1234_s23 }
  0xaf   : > { %424 = vrot.lane.b32.xlu0 %v1317_v24, %s1234_s23  ;;  %451 = vrot.lane.b32.xlu1 %v394_v34, %s1233_s22 }
  0xb3   : > { %408 = vrot.lane.b32.xlu0 %v1329_v32, %s1237_s25  ;;  %435 = vrot.lane.b32.xlu1 %v395_v33, %s1235_s24 }
  0xb7   : > { %406 = vrot.lane.b32.xlu0 %v1317_v24, %s1237_s25  ;;  %433 = vrot.lane.b32.xlu1 %v394_v34, %s1235_s24 }
  0xbb   : > { %399 = vrot.lane.b32.xlu0 %v395_v33, %s1239_s27  ;;  %417 = vrot.lane.b32.xlu1 %v395_v33, %s1238_s26  ;;  %v1410_v33 = vld [vmem:[%s1595_s7 + $0x78] sm:$0xff] }
  0xbf   : > { %522 = vperm.xlu0 %1220, %v519_v35   ;;  %415 = vrot.lane.b32.xlu1 %v394_v34, %s1238_s26  ;;  %v1422_v35 = vld [vmem:[%s1595_s7 + $0x70] sm:$0xff] }
  0xc3   : > { %397 = vrot.lane.b32.xlu1 %v394_v34, %s1239_s27  ;;  %v1416_v34 = vld [vmem:[%s1595_s7 + $0xf0] sm:$0xff] }
 0x105   : > { %v465_v36 = vpop.permute.xlu1 %464  ;;  %v461_v37 = vpop.permute.xlu0 %460 }
 0x106   : > { %v536_v38 = vsel %vm469_vm1, %v465_v36, 0 }
 0x107   : > { %1164 = vmatpush3.bf16.msra.mxu1 %v536_v38  ;;  %v1438_v38 = vld [vmem:[%s1595_s7 + $0xe0] sm:$0xff] }
 0x108   : > { %1165 = vmatprep.subr.bf16.mxu1 %v1230_v10 }
 0x109   : > { %v447_v39 = vpop.permute.xlu1 %446  ;;  %v456_v40 = vpop.permute.xlu0 %455 }
 0x10a   : > { %v516_v41 = vsel %vm469_vm1, %v447_v39, %v456_v40 }
 0x10b   : > { %1166 = vmatpush3.bf16.msra.mxu1 %v516_v41  ;;  %v1456_v41 = vld [vmem:[%s1595_s7 + $0x58] sm:$0xff] }
 0x10c   : > { %1167 = vmatprep.subr.bf16.mxu1 %v1230_v10 }
 0x10d   : > { %v429_v42 = vpop.permute.xlu1 %428  ;;  %v438_v43 = vpop.permute.xlu0 %437 }
 0x10e   : > { %v504_v44 = vsel %vm469_vm1, %v429_v42, %v438_v43 }
 0x10f   : > { %1168 = vmatpush3.bf16.msra.mxu1 %v504_v44  ;;  %v1474_v44 = vld [vmem:[%s1595_s7 + $0xc8] sm:$0xff] }
 0x110   : > { %1169 = vmatprep.subr.bf16.mxu1 %v1230_v10 }
 0x111   : > { %v411_v45 = vpop.permute.xlu1 %410  ;;  %v420_v46 = vpop.permute.xlu0 %419 }
 0x112   : > { %v492_v47 = vsel %vm469_vm1, %v411_v45, %v420_v46 }
 0x113   : > { %1170 = vmatpush3.bf16.msra.mxu1 %v492_v47  ;;  %v1492_v47 = vld [vmem:[%s1595_s7 + $0x40] sm:$0xff] }
 0x114   : > { %1171 = vmatprep.subr.bf16.mxu1 %v1230_v10 }
 0x115   : > { %v463_v48 = vpop.permute.xlu1 %462  ;;  %v445_v49 = vpop.permute.xlu0 %444 }
 0x116   : > { %v468_v50 = vsel %vm466_vm2, %v463_v48, %v465_v36  ;;  %v467_v51 = vsel %vm466_vm2, %v461_v37, %v463_v48  ;;  %v450_v60 = vsel %vm448_vm3, %v445_v49, %v447_v39  ;;  %v1427_v36 = vld [vmem:[%s1595_s7 + $0xe8] sm:$0xff]  ;;  %v1444_v39 = vld [vmem:[%s1595_s7 + $0x60] sm:$0xff]  ;;  %v645_v48 = vld [vmem:[%s1595_s7 + $0xb8] sm:$0xff] }
 0x117   : > { %1066 = vmatprep.subr.msk.bf16.mxu0 %vm469_vm1, %v468_v50  ;;  %v530_v52 = vsel %vm469_vm1, %v467_v51, 0  ;;  %v1432_v37 = vld [vmem:[%s1595_s7 + $0x68] sm:$0xff]  ;;  %v644_v50 = vld [vmem:[%s1595_s7 + $0xb0] sm:$0xff] }
 0x118   : > { %545 = vmatpush1.bf16.msra.mxu0 %v530_v52  ;;  %v628_v51 = vld [vmem:[%s1595_s7 + $0x30] sm:$0xff]  ;;  %v643_v52 = vld [vmem:[%s1595_s7 + $0xa8] sm:$0xff] }
 0x119   : > { %v402_v53 = vpop.permute.xlu1 %401  ;;  %v443_v54 = vpop.permute.xlu0 %442 }
 0x11a   : > { %v480_v55 = vsel %vm469_vm1, %v1319_v25, %v402_v53  ;;  %v449_v1 = vsel %vm448_vm3, %v443_v54, %v445_v49  ;;  %v629_v49 = vld [vmem:[%s1595_s7 + $0x38] sm:$0xff]  ;;  %v642_v54 = vld [vmem:[%s1595_s7 + $0xa0] sm:$0xff] }
 0x11b   : > { %1172 = vmatpush3.bf16.msra.mxu1 %v480_v55  ;;  %v626_v55 = vld [vmem:[%s1595_s7 + $0x20] sm:$0xff] }
 0x11c   : > { %1177 = vmatprep.subr.mxu1 %v1230_v10 }
 0x11d   : > { %v454_v58 = vpop.permute.xlu1 %453  ;;  %v427_v59 = vpop.permute.xlu0 %426 }
 0x11e   : > { %v459_v61 = vsel %vm457_vm4, %v454_v58, %v456_v40  ;;  %1174 = vmatmul.mubr.msk.bf16.vlgmr.msra.gmra.mxu1 %vm525_vm5, %v518_v56  ;;  %v432_v6 = vsel %vm430_vm6, %v427_v59, %v429_v42  ;;  %v1450_v40 = vld [vmem:[%s1595_s7 + $0xd8] sm:$0xff]  ;;  %v1462_v42 = vld [vmem:[%s1595_s7 + $0xd0] sm:$0xff] }
 0x11f   : > { %v512_v62 = vsel %vm469_vm1, %v450_v60, %v459_v61  ;;  %1178 = vmatpush3.msra.mxu1 %v1362_v57  ;;  %1185 = vmatprep.mubr.msk.f32.mxu1 %vm1236_vm0, %v1230_v10  ;;  %v624_v60 = vld [vmem:[%s1595_s7 + $0x10] sm:$0xff]  ;;  %v639_v61 = vld [vmem:[%s1595_s7 + $0x88] sm:$0xff] }
 0x120   : > { %546 = vmatprep.subr.bf16.mxu0 %v512_v62  ;;  %1179 = vmatprep.subr.mxu1 %v1230_v10  ;;  %v623_v62 = vld [vmem:[%s1595_s7 + $0x8] sm:$0xff] }
 0x121   : > { %v425_v63 = vpop.permute.xlu0 %424  ;;  %v452_v0 = vpop.permute.xlu1 %451  ;;  %1180 = vmatpush3.msra.mxu1 %v1387_v30 }
 0x122   : > { %v458_v2 = vsel %vm457_vm4, %v452_v0, %v454_v58  ;;  %v431_v12 = vsel %vm430_vm6, %v425_v63, %v427_v59  ;;  %1181 = vmatprep.subr.mxu1 %v1230_v10  ;;  %v625_v58 = vld [vmem:[%s1595_s7 + $0x18] sm:$0xff]  ;;  %v640_v59 = vld [vmem:[%s1595_s7 + $0x90] sm:$0xff]  ;;  %v638_v63 = vld [vmem:[%s1595_s7 + $0x80] sm:$0xff] }
 0x123   : > { %v508_v3 = vsel %vm469_vm1, %v449_v1, %v458_v2  ;;  %1182 = vmatpush3.msra.mxu1 %v1394_v31  ;;  %v622_v0 = vld [vmem:[%s1595_s7] sm:$0xff] }
 0x124   : > { %547 = vmatpush1.bf16.msra.mxu0 %v508_v3  ;;  %1183 = vmatprep.subr.mxu1 %v1230_v10 }
 0x125   : > { %v409_v4 = vpop.permute.xlu0 %408  ;;  %v436_v5 = vpop.permute.xlu1 %435 }
 0x126   : > { %v441_v7 = vsel %vm439_vm7, %v436_v5, %v438_v43  ;;  %v414_v16 = vsel %vm412_vm8, %v409_v4, %v411_v45  ;;  %v1468_v43 = vld [vmem:[%s1595_s7 + $0x50] sm:$0xff]  ;;  %v1480_v45 = vld [vmem:[%s1595_s7 + $0x48] sm:$0xff] }
 0x127   : > { %v500_v8 = vsel %vm469_vm1, %v432_v6, %v441_v7 }
 0x128   : > { %548 = vmatprep.subr.bf16.mxu0 %v500_v8 }
 0x129   : > { %v407_v9 = vpop.permute.xlu0 %406  ;;  %v434_v11 = vpop.permute.xlu1 %433 }
 0x12a   : > { %v440_v13 = vsel %vm439_vm7, %v434_v11, %v436_v5  ;;  %v413_v22 = vsel %vm412_vm8, %v407_v9, %v409_v4 }
 0x12b   : > { %v496_v14 = vsel %vm469_vm1, %v431_v12, %v440_v13 }
 0x12c   : > { %549 = vmatpush1.bf16.msra.mxu0 %v496_v14 }
 0x12d   : > { %v418_v15 = vpop.permute.xlu1 %417  ;;  %v400_v17 = vpop.permute.xlu0 %399 }
 0x12e   : > { %v423_v18 = vsel %vm421_vm9, %v418_v15, %v420_v46  ;;  %v405_v20 = vsel %vm403_vm10, %v400_v17, %v402_v53  ;;  %v1486_v46 = vld [vmem:[%s1595_s7 + $0xc0] sm:$0xff]  ;;  %v627_v53 = vld [vmem:[%s1595_s7 + $0x28] sm:$0xff] }
 0x12f   : > { %v488_v19 = vsel %vm469_vm1, %v414_v16, %v423_v18  ;;  %v476_v26 = vsel %vm469_vm1, %v1329_v32, %v405_v20  ;;  %v1404_v32 = vld [vmem:[%s1595_s7 + $0x100] sm:$0xff] }
 0x130   : > { %550 = vmatprep.subr.bf16.mxu0 %v488_v19  ;;  %1184 = vmatpush3.msra.mxu1 %v1404_v32 }
 0x131   : > { %v416_v21 = vpop.permute.xlu1 %415 }
 0x132   : > { %v422_v23 = vsel %vm421_vm9, %v416_v21, %v418_v15 }
 0x133   : > { %v484_v25 = vsel %vm469_vm1, %v413_v22, %v422_v23 }
 0x134   : > { %551 = vmatpush1.bf16.msra.mxu0 %v484_v25 }
 0x135   : > { %552 = vmatprep.subr.bf16.mxu0 %v476_v26  ;;  %v398_v27 = vpop.permute.xlu1 %397 }
 0x136   : > { %v404_v28 = vsel %vm403_vm10, %v398_v27, %v400_v17 }
 0x137   : > { %v472_v29 = vsel %vm469_vm1, %v1317_v24, %v404_v28  ;;  %v653_v24 = vld [vmem:[%s1595_s7 + $0xf8] sm:$0xff] }
 0x138   : > { %553 = vmatpush1.bf16.msra.mxu0 %v472_v29  ;;  %1123 = vmatprep.subr.mxu1 %v653_v24 }
 0x139   : > { %1083 = vmatprep.subr.mxu0 %v653_v24 }
 0x13a   : > { %v523_v1 = vpop.permute.xlu0 %522 }
 0x13b   : > { %1067 = vmatmul.mubr.msk.bf16.vlgmr.msra.gmra.mxu0 %vm525_vm5, %v518_v56  ;;  %v641_v56 = vld [vmem:[%s1595_s7 + $0x98] sm:$0xff] }
 0x13c   : > { %1084 = vmatpush3.msra.mxu0 %v1410_v33 }
 0x13d   : > { %1085 = vmatprep.subr.mxu0 %v1416_v34 }
 0x13e   : > { %1086 = vmatpush3.msra.mxu0 %v1422_v35 }
 0x13f   : > { %1087 = vmatprep.subr.mxu0 %v1427_v36 }
 0x140   : > { %1088 = vmatpush3.msra.mxu0 %v1432_v37 }
 0x141   : > { %1089 = vmatprep.subr.mxu0 %v1438_v38 }
 0x142   : > { %1090 = vmatpush3.msra.mxu0 %v1444_v39 }
 0x143   : > { %1091 = vmatprep.subr.mxu0 %v1450_v40 }
 0x144   : > { %1092 = vmatpush3.msra.mxu0 %v1456_v41 }
 0x145   : > { %1093 = vmatprep.subr.mxu0 %v1462_v42 }
 0x146   : > { %1094 = vmatpush3.msra.mxu0 %v1468_v43 }
 0x147   : > { %1095 = vmatprep.subr.mxu0 %v1474_v44 }
 0x148   : > { %1096 = vmatpush3.msra.mxu0 %v1480_v45 }
 0x149   : > { %1097 = vmatprep.subr.mxu0 %v1486_v46 }
 0x14a   : > { %1098 = vmatpush3.msra.mxu0 %v1492_v47 }
 0x14b   : > { %1099 = vmatprep.subr.mxu0 %v645_v48 }
 0x14c   : > { %1100 = vmatpush3.msra.mxu0 %v629_v49 }
 0x14d   : > { %1101 = vmatprep.subr.mxu0 %v644_v50 }
 0x14e   : > { %1102 = vmatpush3.msra.mxu0 %v628_v51 }
 0x14f   : > { %1103 = vmatprep.subr.mxu0 %v643_v52 }
 0x150   : > { %1104 = vmatpush3.msra.mxu0 %v627_v53 }
 0x151   : > { %1105 = vmatprep.subr.mxu0 %v642_v54 }
 0x152   : > { %1106 = vmatpush3.msra.mxu0 %v626_v55 }
 0x153   : > { %1107 = vmatprep.subr.mxu0 %v641_v56 }
 0x154   : > { %1108 = vmatpush3.msra.mxu0 %v625_v58 }
 0x155   : > { %1109 = vmatprep.subr.mxu0 %v640_v59 }
 0x156   : > { %1110 = vmatpush3.msra.mxu0 %v624_v60 }
 0x157   : > { %1111 = vmatprep.subr.mxu0 %v639_v61 }
 0x158   : > { %1112 = vmatpush3.msra.mxu0 %v623_v62 }
 0x159   : > { %1113 = vmatprep.subr.mxu0 %v638_v63 }
 0x15a   : > { %1114 = vmatpush3.msra.mxu0 %v622_v0 }
 0x15b   : > { %1188 = vmatprep.subr.mxu0 %v1230_v10 }
 0x1de   : > { %v613_v2 = vpop.f32.mrf.mxu1 }
 0x1df   : > { %v614_v3 = vadd.f32 %v613_v2, %v523_v1 }
 0x1e0   : > { %v1175_v4 = vpop.f32.mrf.mxu1 }
 0x1e1   : > { %v621_v5 = vmax.f32 %v614_v3, 0.0 }
 0x1e2   : > { %v616_v6 = vpop.f32.mrf.mxu1 }
 0x1e3   : > { %v1076_v7 = vpack.c.bf16 %v621_v5, %v621_v5  ;;  %1186 = vmatmul.mubr.msk.f32.vlgmr.msra.gmra.mxu1 %vm658_vm11, %v621_v5  ;;  %v804_v21 = vmul.f32 %v621_v5, %v621_v5 }
 0x1e4   : > { %v1176_v8 = vpop.f32.mrf.mxu1  ;;  %1124 = vmatpush3.msra.mxu1 %v1410_v33 }
 0x1e5   : > { %1125 = vmatprep.subr.mxu1 %v1416_v34  ;;  %971 = vst.msk [vmem:[%s1551_s10 + $0x8] sm:$0xf] %vm970_vm12, %v1076_v7 }
 0x1e6   : > { %1126 = vmatpush3.msra.mxu1 %v1422_v35 }
 0x1e7   : > { %1127 = vmatprep.subr.mxu1 %v1427_v36 }
 0x1e8   : > { %1128 = vmatpush3.msra.mxu1 %v1432_v37 }
 0x1e9   : > { %1129 = vmatprep.subr.mxu1 %v1438_v38 }
 0x1ea   : > { %1130 = vmatpush3.msra.mxu1 %v1444_v39 }
 0x1eb   : > { %1131 = vmatprep.subr.mxu1 %v1450_v40 }
 0x1ec   : > { %1132 = vmatpush3.msra.mxu1 %v1456_v41 }
 0x1ed   : > { %1133 = vmatprep.subr.mxu1 %v1462_v42 }
 0x1ee   : > { %1134 = vmatpush3.msra.mxu1 %v1468_v43 }
 0x1ef   : > { %1135 = vmatprep.subr.mxu1 %v1474_v44 }
 0x1f0   : > { %1136 = vmatpush3.msra.mxu1 %v1480_v45 }
 0x1f1   : > { %1137 = vmatprep.subr.mxu1 %v1486_v46 }
 0x1f2   : > { %1138 = vmatpush3.msra.mxu1 %v1492_v47 }
 0x1f3   : > { %1139 = vmatprep.subr.mxu1 %v645_v48 }
 0x1f4   : > { %1140 = vmatpush3.msra.mxu1 %v629_v49 }
 0x1f5   : > { %1141 = vmatprep.subr.mxu1 %v644_v50 }
 0x1f6   : > { %1142 = vmatpush3.msra.mxu1 %v628_v51 }
 0x1f7   : > { %1143 = vmatprep.subr.mxu1 %v643_v52 }
 0x1f8   : > { %1144 = vmatpush3.msra.mxu1 %v627_v53 }
 0x1f9   : > { %1145 = vmatprep.subr.mxu1 %v642_v54 }
 0x1fa   : > { %1146 = vmatpush3.msra.mxu1 %v626_v55 }
 0x1fb   : > { %v572_v9 = vpop.f32.mrf.mxu0  ;;  %1147 = vmatprep.subr.mxu1 %v641_v56 }
 0x1fc   : > { %v573_v11 = vadd.f32 %v572_v9, %v523_v1  ;;  %1148 = vmatpush3.msra.mxu1 %v625_v58 }
 0x1fd   : > { %v574_v12 = vpop.f32.mrf.mxu0  ;;  %1149 = vmatprep.subr.mxu1 %v640_v59 }
 0x1fe   : > { %v575_v13 = vadd.f32 %v574_v12, %v523_v1  ;;  %1150 = vmatpush3.msra.mxu1 %v624_v60  ;;  %v619_v14 = vmax.f32 %v573_v11, 0.0 }
 0x1ff   : > { %v576_v15 = vpop.f32.mrf.mxu0  ;;  %1151 = vmatprep.subr.mxu1 %v639_v61 }
 0x200   : > { %v620_v16 = vmax.f32 %v575_v13, 0.0  ;;  %1152 = vmatpush3.msra.mxu1 %v623_v62  ;;  %v802_v20 = vmul.f32 %v619_v14, %v619_v14 }
 0x201   : > { %v577_v17 = vpop.f32.mrf.mxu0  ;;  %1153 = vmatprep.subr.mxu1 %v638_v63 }
 0x202   : > { %v1075_v18 = vpack.c.bf16 %v620_v16, %v619_v14  ;;  %726 = vmatprep.mubr.f32.mxu0 %v620_v16  ;;  %1154 = vmatpush3.msra.mxu1 %v622_v0  ;;  %v803_v19 = vmul.f32 %v620_v16, %v620_v16 }
 0x203   : > { %727 = vmatmul.mubr.f32.vlgmr.msra.gmra.mxu0 %v619_v14 }
 0x204   : > { %969 = vst [vmem:[%s1551_s10] sm:$0xff] %v1075_v18  ;;  %1189 = vmatpush3.msra.mxu0 %v1362_v57  ;;  %872 = vmatprep.mubr.f32.mxu1 %v803_v19 }
 0x205   : > { %1190 = vmatprep.subr.mxu0 %v1230_v10  ;;  %873 = vmatmul.mubr.f32.vlgmr.msra.gmra.mxu1 %v802_v20 }
 0x206   : > { %1191 = vmatpush3.msra.mxu0 %v1387_v30  ;;  %1196 = vmatprep.mubr.msk.f32.mxu0 %vm1236_vm0, %v1230_v10 }
 0x207   : > { %1192 = vmatprep.subr.mxu0 %v1230_v10 }
 0x208   : > { %1193 = vmatpush3.msra.mxu0 %v1394_v31 }
 0x209   : > { %1194 = vmatprep.subr.mxu0 %v1230_v10 }
 0x20a   : > { %1195 = vmatpush3.msra.mxu0 %v1404_v32 }
 0x20b   : > { %1197 = vmatmul.mubr.msk.f32.vlgmr.msra.gmra.mxu0 %vm658_vm11, %v804_v21 }
 0x2a3   : > { %v798_v57 = vpop.f32.mrf.mxu1 }
 0x2a5   : > { %v1187_v22 = vpop.f32.mrf.mxu1 }
 0x2c3   : > { %v1115_v23 = vpop.f32.mrf.mxu0 }
 0x2c5   : > { %v1116_v25 = vpop.f32.mrf.mxu0  ;;  %v1155_v26 = vpop.f32.mrf.mxu1 }
 0x2c6   : > { %v1117_v27 = vadd.f32 %v1116_v25, %v1115_v23 }
 0x2c7   : > { %v1156_v28 = vpop.f32.mrf.mxu1 }
 0x2c8   : > { %v799_v29 = vadd.f32 %v1117_v27, %v798_v57  ;;  %v1157_v30 = vadd.f32 %v1156_v28, %v1155_v26 }
 0x2cb   : > { %v944_v24 = vpop.f32.mrf.mxu0 }
 0x2cc   : > { %v945_v33 = vadd.f32 %v1157_v30, %v944_v24 }
 0x2cd   : > { %v1198_v31 = vpop.f32.mrf.mxu0 }
 0x2ce   : > { %949 = vrot.lane.b32.xlu1 %v945_v33, %s1240_s14 }
 0x340   : > { %v950_v10 = vpop.permute.xlu1 %949 }
 0x341   : > { %v953_v32 = vsel %vm952_vm13, %v799_v29, %v950_v10 }
 0x342   : > { %955 = vst.msk [vmem:[%s343_s15] sm:$0xff] %vm954_vm14, %v953_v32 }
 0x343 PF: > { %s20_s30 = sadd.s32 1, %s1227_s30  }
 0x344   : > { %p17_p4 = scmp.ge.s32.totalorder %s20_s30, 4  }
 0x346   :  { %19 = sbr.rel (!%p17_p4) target bundleno = 1 (0x1), region = 94 }

// kernel: unet_conv_block.3
= control target key start
LH: loop header
LB: loop body
LE: loop exit
PB: predicated region body
PF: predicated region fallthrough
CT: control target
= control target key end

     0   :  { %s1450_s30 = smov 0   ;;  %s1787_s0 = inlined_call_operand.vmem [shape: f32[2,4,256], index: 0, kind: input, shape index: {}]   ;;  %s1788_s1 = inlined_call_operand.vmem [shape: bf16[8,36], index: 1, kind: input, shape index: {}]   ;;  %s1789_s2 = inlined_call_operand.vmem [shape: f32[8,1], index: 2, kind: input, shape index: {}]   ;;  %s1790_s3 = inlined_call_operand.vmem [shape: f32[4,1], index: 3, kind: input, shape index: {}]   ;;  %s1791_s4 = inlined_call_operand.vmem [shape: f32[4,1], index: 4, kind: input, shape index: {}]   ;;  %s1792_s5 = inlined_call_operand.vmem [shape: f32[1,256], index: 5, kind: input, shape index: {}]   ;;  %s1793_s6 = inlined_call_operand.vmem [shape: f32[1,288], index: 6, kind: input, shape index: {}]   ;;  %s1794_s7 = inlined_call_operand.vmem [shape: f32[288,1], index: 7, kind: input, shape index: {}]   ;;  %s1795_s8 = inlined_call_operand.vmem [shape: bf16[2,8,326], index: 8, kind: output, shape index: {0}]   ;;  %s1796_s9 = inlined_call_operand.vmem [shape: f32[2,8,2], index: 9, kind: output, shape index: {1}]  }
   0x1 LB: > { %s1188_s3 = sadd.s32 4294967295, %s1370_s30   ;;  %p1192_p0 = scmp.ge.s32.totalorder %s1370_s30, 1  ;;  %s1370_s30 = sphi %s1450_s30, %s20_s30  }
   0x2   : > { %p290_p1 = scmp.lt.s32.totalorder %s1370_s30, 3 }
   0x4   : > { %p291_p2 = pnand %p1192_p0, %p290_p1 }
   0x5   : > { %p330_p3 = scmp.lt.s32.totalorder (!%p291_p2), %s1188_s3, 1  ;;  %s1373_s12 = smov (!%p291_p2), 23  }
   0x6   : > { %294 = sbr.rel (%p291_p2) target bundleno = 855 (0x357), region = 52  ;;  %s1374_s13 = smov (!%p291_p2), 19  }
   0x7   : > { %s1375_s14 = smov (!%p291_p2), 25   ;;  %s1376_s15 = smov (!%p291_p2), 21  }
   0x8   : > { %s1377_s16 = smov (!%p291_p2), 27   ;;  %s1378_s17 = smov (!%p291_p2), 31  }
   0x9   : > { %s1379_s18 = smov (!%p291_p2), 33   ;;  %s1380_s19 = smov (!%p291_p2), 29  }
   0xa   : > { %s1381_s20 = smov (!%p291_p2), 37   ;;  %s1382_s21 = smov (!%p291_p2), 35  }
   0xb   : > { %v1372_v0 = vmov 0.0   ;;  %s1798_s3 = smov (!%p330_p3, %s1188_s3), 1  ;;  %vm346_vm0 = vcmask 568320   ;;  %s1383_s22 = smov 45   ;;  %vm353_vm1 = vcmask 281752   ;;  %vm360_vm2 = vcmask 429352  }
   0xc   : > { %345 = vst [vmem:[#allocation2] sm:$0xff] %v1372_v0  ;;  %1293 = vmatprep.subr.bf16.mxu1 %v1372_v0  ;;  %s1206_s4 = sshll.u32 %s1798_s3, 3  ;;  %347 = vst.msk [vmem:[#allocation2 + $0x8] sm:$0xf] %vm346_vm0, %v1372_v0  ;;  %s1384_s23 = smov 39   ;;  %vm367_vm3 = vcmask 576952  }
   0xd   : > { %s1468_s11 = scalar_lea.vmem %s1787_s0, %s1206_s4  ;;  %s1385_s24 = smov 41   ;;  %vm374_vm4 = vcmask 724552   ;;  %vm381_vm5 = vcmask 872152   ;;  %vm398_vm6 = vcmask 1044472   ;;  %vm399_vm7 = vcmask 121860   ;;  %v614_v53 = vld [vmem:[%s1789_s2] sm:$0xff] }
   0xe   : > { %v362_v1 = vld [vmem:[%s1468_s11] sm:$0xf]  ;;  %v416_v9 = vld [vmem:[%s1468_s11 + $0x4] sm:$0xf]  ;;  %s1386_s25 = smov 43   ;;  %s1387_s26 = smov 47   ;;  %vm400_vm10 = vmor %vm399_vm7, %vm398_vm6 }
   0xf   : > { %v348_v2 = vld [vmem:[%s1468_s11] sm:$0xf]  ;;  %364 = vrot.lane.b32.xlu1 %v362_v1, %s1373_s12  ;;  %v409_v10 = vld [vmem:[%s1468_s11 + $0x4] sm:$0xf]  ;;  %s1388_s27 = smov 49   ;;  %vm395_vm8 = vcmask 252928  }
  0x10   : > { %350 = vrot.lane.b32.xlu0 %v348_v2, %s1374_s13  ;;  %v369_v3 = vld [vmem:[%s1468_s11] sm:$0xf]  ;;  %v444_v11 = vld [vmem:[%s1468_s11 + $0x4] sm:$0xf]  ;;  %vm388_vm9 = vcmask 1019752   ;;  %vm407_vm11 = vcmask 265352  }
  0x11   : > { %v355_v4 = vld [vmem:[%s1468_s11] sm:$0xf]  ;;  %v423_v12 = vld [vmem:[%s1468_s11 + $0x4] sm:$0xf]  ;;  %vm414_vm12 = vcmask 412952   ;;  %vm421_vm13 = vcmask 560552  }
  0x12   : > { %v376_v5 = vld [vmem:[%s1468_s11] sm:$0xf]  ;;  %v430_v13 = vld [vmem:[%s1468_s11 + $0x4] sm:$0xf]  ;;  %vm428_vm14 = vcmask 708152   ;;  %vm452_vm15 = vcmask 1044456  }
  0x13   : > { %371 = vrot.lane.b32.xlu1 %v369_v3, %s1375_s14  ;;  %v390_v6 = vld [vmem:[%s1468_s11] sm:$0xf]  ;;  %v437_v14 = vld [vmem:[%s1468_s11 + $0x4] sm:$0xf]  ;;  %vm453_vm0 = vcmask 105476   ;;  %vm468_vm6 = vcmask 396552  }
  0x14   : > { %357 = vrot.lane.b32.xlu0 %v355_v4, %s1376_s15  ;;  %v402_v7 = vld [vmem:[%s1468_s11] sm:$0xf]  ;;  %v456_v15 = vld [vmem:[%s1468_s11 + $0x4] sm:$0xf]  ;;  %s1389_s28 = smov 90   ;;  %s1390_s29 = smov 109  }
  0x15   : > { %v383_v8 = vld [vmem:[%s1468_s11] sm:$0xf]  ;;  %v463_v16 = vld [vmem:[%s1468_s11 + $0x4] sm:$0xf]  ;;  %s1391_s5 = smov 92   ;;  %s1392_s10 = smov 108  }
  0x16   : > { %vm1393_vm7 = vmmov 0   ;;  %s1394_s11 = smov 127   ;;  %s1395_s12 = smov 91   ;;  %v1398_v52 = vmov 0  }
  0x17   : > { %378 = vrot.lane.b32.xlu1 %v376_v5, %s1377_s16  ;;  %1299 = vmatprep.mubr.msk.bf16.mxu1 %vm1393_vm7, %v1372_v0  ;;  %s1396_s14 = smov 126   ;;  %s1397_s15 = smov 110  }
  0x18   : > { %392 = vrot.lane.b32.xlu0 %v390_v6, %s1378_s17  ;;  %s1325_s16 = smul.u32 12, %s1798_s3  ;;  %665 = vmatprep.mubr.bf16.mxu0 %v1398_v52 }
  0x19   : > { %1362 = vset.pattern.permute.xlu0 %v1398_v52 }
  0x1b   : > { %404 = vrot.lane.b32.xlu1 %v402_v7, %s1379_s18 }
  0x1c   : > { %385 = vrot.lane.b32.xlu0 %v383_v8, %s1380_s19  ;;  %s1519_s19 = scalar_lea.vmem %s1795_s8, %s1325_s16 }
  0x1f   : > { %418 = vrot.lane.b32.xlu1 %v416_v9, %s1381_s20 }
  0x20   : > { %411 = vrot.lane.b32.xlu0 %v409_v10, %s1382_s21 }
  0x23   : > { %446 = vrot.lane.b32.xlu1 %v444_v11, %s1383_s22 }
  0x24   : > { %425 = vrot.lane.b32.xlu0 %v423_v12, %s1384_s23 }
  0x27   : > { %439 = vrot.lane.b32.xlu1 %v437_v14, %s1386_s25  ;;  %v613_v14 = vld [vmem:[%s1788_s1] sm:$0xf] }
  0x28   : > { %432 = vrot.lane.b32.xlu0 %v430_v13, %s1385_s24 }
  0x2b   : > { %465 = vrot.lane.b32.xlu1 %v463_v16, %s1388_s27 }
  0x2c   : > { %458 = vrot.lane.b32.xlu0 %v456_v15, %s1387_s26  ;;  %v1546_v15 = vld [vmem:[%s1794_s7 + $0x118] sm:$0xff] }
  0x81   : > { %v365_v17 = vpop.permute.xlu1 %364 }
  0x82   : > { %v351_v18 = vpop.permute.xlu0 %350 }
  0x83   : > { %354 = vst.msk [vmem:[#allocation2] sm:$0xf] %vm353_vm1, %v351_v18  ;;  %vm435_vm1 = vcmask 855752   ;;  %v1552_v18 = vld [vmem:[%s1794_s7 + $0x110] sm:$0xff] }
  0x85   : > { %v372_v19 = vpop.permute.xlu1 %371 }
  0x86   : > { %v358_v20 = vpop.permute.xlu0 %357 }
  0x87   : > { %361 = vst.msk [vmem:[#allocation2] sm:$0xf] %vm360_vm2, %v358_v20  ;;  %vm449_vm2 = vcmask 367616  }
  0x88   : > { %368 = vst.msk [vmem:[#allocation2] sm:$0xf] %vm367_vm3, %v365_v17  ;;  %vm442_vm3 = vcmask 1003352  }
  0x89   : > { %375 = vst.msk [vmem:[#allocation2] sm:$0xf] %vm374_vm4, %v372_v19  ;;  %v379_v21 = vpop.permute.xlu1 %378  ;;  %vm454_vm4 = vmor %vm453_vm0, %vm452_vm15  ;;  %vm541_vm15 = vcmask 752640   ;;  %vm532_vm0 = vcmask 883712  }
  0x8a   : > { %v393_v22 = vpop.permute.xlu0 %392  ;;  %382 = vst.msk [vmem:[#allocation2] sm:$0xf] %vm381_vm5, %v379_v21  ;;  %vm461_vm5 = vcmask 248952  }
  0x8b   : > { %v394_v23 = vrot.slane %v393_v22, 4 }
  0x8d   : > { %v405_v24 = vpop.permute.xlu1 %404  ;;  %v396_v26 = vsel %vm395_vm8, %v394_v23, %v393_v22  ;;  %vm1074_vm8 = vcmask 150528  }
  0x8e   : > { %v386_v25 = vpop.permute.xlu0 %385  ;;  %1075 = vst.msk [vmem:[%s1519_s19] sm:$0xf] %vm1074_vm8, %v1398_v52  ;;  %vm1095_vm8 = vcmask 1047556  }
  0x8f   : > { %389 = vst.msk [vmem:[#allocation2] sm:$0xf] %vm388_vm9, %v386_v25  ;;  %vm562_vm9 = vcmask 1041408  }
  0x90   : > { %401 = vst.msk [vmem:[#allocation2] sm:$0xff] %vm400_vm10, %v396_v26  ;;  %vm559_vm10 = vcmask 736256  }
  0x91   : > { %408 = vst.msk [vmem:[#allocation2 + $0x4] sm:$0xf] %vm407_vm11, %v405_v24  ;;  %v419_v27 = vpop.permute.xlu1 %418  ;;  %vm572_vm11 = vcmask 1043456  }
  0x92   : > { %v412_v28 = vpop.permute.xlu0 %411 }
  0x93   : > { %415 = vst.msk [vmem:[#allocation2 + $0x4] sm:$0xf] %vm414_vm12, %v412_v28  ;;  %vm579_vm12 = vcmask 1045504  }
  0x94   : > { %422 = vst.msk [vmem:[#allocation2 + $0x4] sm:$0xf] %vm421_vm13, %v419_v27  ;;  %vm620_vm13 = vcmask 293888  }
  0x95   : > { %v447_v29 = vpop.permute.xlu1 %446 }
  0x96   : > { %v426_v30 = vpop.permute.xlu0 %425  ;;  %v448_v31 = vrot.slane %v447_v29, 4 }
  0x97   : > { %429 = vst.msk [vmem:[#allocation2 + $0x4] sm:$0xf] %vm428_vm14, %v426_v30  ;;  %vm523_vm14 = vcmask 891904  }
  0x98   : > { %v450_v34 = vsel %vm449_vm2, %v448_v31, %v447_v29  ;;  %vm490_vm2 = vcmask 1039360  }
  0x99   : > { %v440_v33 = vpop.permute.xlu1 %439 }
  0x9a   : > { %v433_v32 = vpop.permute.xlu0 %432 }
  0x9b   : > { %436 = vst.msk [vmem:[#allocation2 + $0x4] sm:$0xf] %vm435_vm1, %v433_v32  ;;  %vm550_vm1 = vcmask 744448  }
  0x9c   : > { %443 = vst.msk [vmem:[#allocation2 + $0x4] sm:$0xf] %vm442_vm3, %v440_v33  ;;  %vm502_vm3 = vcmask 1031168  }
  0x9d   : > { %455 = vst.msk [vmem:[#allocation2 + $0x4] sm:$0xff] %vm454_vm4, %v450_v34  ;;  %v466_v36 = vpop.permute.xlu1 %465  ;;  %vm514_vm4 = vcmask 900096  }
  0x9e   : > { %v459_v35 = vpop.permute.xlu0 %458 }
  0x9f   : > { %462 = vst.msk [vmem:[#allocation2 + $0x8] sm:$0xf] %vm461_vm5, %v459_v35  ;;  %vm753_vm5 = vcmask 261120  }
  0xa0   : > { %469 = vst.msk [vmem:[#allocation2 + $0x8] sm:$0xf] %vm468_vm6, %v466_v36  ;;  %vm1094_vm6 = vcmask 1043608  }
  0xa4   : > { %v470_v37 = vld [vmem:[#allocation2] sm:$0xff] }
  0xa5   : > { %v1488_v38 = vpack.c.bf16 %v470_v37, %v470_v37  ;;  %v473_v41 = vcombine.high %v470_v37, %v470_v37 }
  0xa7   : > { %553 = vrot.lane.b32.xlu0 %v1488_v38, %s1389_s28  ;;  %v471_v39 = vld [vmem:[#allocation2 + $0x8] sm:$0xf]  ;;  %v1495_v42 = vpack.c.bf16 %v473_v41, %v473_v41  ;;  %v481_v46 = vrot.slane %v1488_v38, 6  ;;  %v493_v47 = vrot.slane %v1488_v38, 4  ;;  %v505_v49 = vrot.slane %v1488_v38, 2 }
  0xa8   : > { %v1491_v40 = vpack.c.bf16 %v471_v39, %v471_v39 }
  0xa9   : > { %v494_v48 = vrot.slane %v1495_v42, 4  ;;  %v506_v50 = vrot.slane %v1495_v42, 2  ;;  %v482_v51 = vrot.slane %v1495_v42, 6 }
  0xaa   : > { %521 = vrot.lane.b32.xlu1 %v1491_v40, %s1390_s29  ;;  %v495_v43 = vrot.slane %v1491_v40, 4  ;;  %v483_v44 = vrot.slane %v1491_v40, 6  ;;  %v507_v45 = vrot.slane %v1491_v40, 2 }
  0xab   : > { %557 = vrot.lane.b32.xlu0 %v1491_v40, %s1389_s28 }
  0xae   : > { %555 = vrot.lane.b32.xlu1 %v1495_v42, %s1389_s28 }
  0xaf   : > { %519 = vrot.lane.b32.xlu0 %v1495_v42, %s1390_s29 }
  0xb2   : > { %539 = vrot.lane.b32.xlu1 %v495_v43, %s1391_s5 }
  0xb3   : > { %530 = vrot.lane.b32.xlu0 %v483_v44, %s1392_s10 }
  0xb6   : > { %488 = vrot.lane.b32.xlu1 %v483_v44, %s1394_s11 }
  0xb7   : > { %548 = vrot.lane.b32.xlu0 %v507_v45, %s1395_s12 }
  0xba   : > { %526 = vrot.lane.b32.xlu1 %v481_v46, %s1392_s10 }
  0xbb   : > { %500 = vrot.lane.b32.xlu0 %v495_v43, %s1396_s14 }
  0xbe   : > { %512 = vrot.lane.b32.xlu1 %v507_v45, %s1397_s15 }
  0xbf   : > { %517 = vrot.lane.b32.xlu0 %v1488_v38, %s1390_s29 }
  0xc2   : > { %535 = vrot.lane.b32.xlu1 %v493_v47, %s1391_s5 }
  0xc3   : > { %537 = vrot.lane.b32.xlu0 %v494_v48, %s1391_s5 }
  0xc6   : > { %544 = vrot.lane.b32.xlu1 %v505_v49, %s1395_s12 }
  0xc7   : > { %546 = vrot.lane.b32.xlu0 %v506_v50, %s1395_s12 }
  0xca   : > { %484 = vrot.lane.b32.xlu1 %v481_v46, %s1394_s11 }
  0xcb   : > { %486 = vrot.lane.b32.xlu0 %v482_v51, %s1394_s11 }
  0xce   : > { %528 = vrot.lane.b32.xlu1 %v482_v51, %s1392_s10 }
  0xcf   : > { %498 = vrot.lane.b32.xlu0 %v494_v48, %s1396_s14 }
  0xd2   : > { %496 = vrot.lane.b32.xlu1 %v493_v47, %s1396_s14 }
  0xd3   : > { %510 = vrot.lane.b32.xlu0 %v506_v50, %s1397_s15 }
  0xd6   : > { %508 = vrot.lane.b32.xlu1 %v505_v49, %s1397_s15 }
  0xd7   : > { %617 = vperm.xlu0 %1362, %v614_v53  }
 0x119   : > { %v554_v54 = vpop.permute.xlu0 %553 }
 0x11c   : > { %v522_v55 = vpop.permute.xlu1 %521 }
 0x11d   : > { %v558_v56 = vpop.permute.xlu0 %557 }
 0x11e   : > { %v631_v57 = vsel %vm562_vm9, %v558_v56, 0 }
 0x11f   : > { %1294 = vmatpush3.bf16.msra.mxu1 %v631_v57  ;;  %v1594_v57 = vld [vmem:[%s1794_s7 + $0x108] sm:$0xff] }
 0x120   : > { %v556_v58 = vpop.permute.xlu1 %555  ;;  %1295 = vmatprep.subr.bf16.mxu1 %v1372_v0 }
 0x121   : > { %v520_v59 = vpop.permute.xlu0 %519  ;;  %v561_v60 = vsel %vm559_vm10, %v556_v58, %v558_v56  ;;  %v560_v61 = vsel %vm559_vm10, %v554_v54, %v556_v58  ;;  %v748_v56 = vld [vmem:[%s1794_s7 + $0xf8] sm:$0xff]  ;;  %v1601_v58 = vld [vmem:[%s1794_s7 + $0xf0] sm:$0xff]  ;;  %vm1096_vm10 = vmor %vm1095_vm8, %vm1094_vm6 }
 0x122   : > { %1197 = vmatprep.subr.msk.bf16.mxu0 %vm562_vm9, %v561_v60  ;;  %v625_v62 = vsel %vm562_vm9, %v560_v61, 0  ;;  %v525_v23 = vsel %vm523_vm14, %v520_v59, %v522_v55  ;;  %v1613_v60 = vld [vmem:[%s1794_s7 + $0x100] sm:$0xff]  ;;  %v1620_v61 = vld [vmem:[%s1794_s7 + $0xe8] sm:$0xff] }
 0x123   : > { %644 = vmatpush1.bf16.msra.mxu0 %v625_v62  ;;  %v1626_v62 = vld [vmem:[%s1794_s7 + $0x68] sm:$0xff] }
 0x124   : > { %v540_v63 = vpop.permute.xlu1 %539 }
 0x125   : > { %v531_v1 = vpop.permute.xlu0 %530 }
 0x126   : > { %v597_v2 = vsel %vm562_vm9, %v522_v55, %v531_v1 }
 0x127   : > { %v603_v5 = vsel %vm572_vm11, %v597_v2, %v540_v63  ;;  %v1644_v2 = vld [vmem:[%s1794_s7 + $0xd8] sm:$0xff] }
 0x128   : > { %v489_v3 = vpop.permute.xlu1 %488 }
 0x129   : > { %v549_v4 = vpop.permute.xlu0 %548  ;;  %v571_v9 = vsel %vm562_vm9, %v1491_v40, %v489_v3 }
 0x12a   : > { %v611_v6 = vsel %vm579_vm12, %v603_v5, %v549_v4  ;;  %v727_v5 = vld [vmem:[%s1794_s7 + $0x50] sm:$0xff] }
 0x12b   : > { %1296 = vmatpush3.bf16.msra.mxu1 %v611_v6  ;;  %v742_v6 = vld [vmem:[%s1794_s7 + $0xc8] sm:$0xff] }
 0x12c   : > { %v527_v7 = vpop.permute.xlu1 %526  ;;  %1297 = vmatprep.subr.bf16.mxu1 %v1372_v0 }
 0x12d   : > { %v501_v8 = vpop.permute.xlu0 %500 }
 0x12e   : > { %v578_v10 = vsel %vm572_vm11, %v571_v9, %v501_v8  ;;  %v725_v9 = vld [vmem:[%s1794_s7 + $0x40] sm:$0xff] }
 0x130   : > { %v513_v11 = vpop.permute.xlu1 %512 }
 0x131   : > { %v518_v12 = vpop.permute.xlu0 %517  ;;  %v587_v13 = vsel %vm579_vm12, %v578_v10, %v513_v11  ;;  %v740_v10 = vld [vmem:[%s1794_s7 + $0xb8] sm:$0xff] }
 0x132   : > { %1298 = vmatpush3.bf16.msra.mxu1 %v587_v13  ;;  %v524_v24 = vsel %vm523_vm14, %v518_v12, %v520_v59  ;;  %v1608_v59 = vld [vmem:[%s1794_s7 + $0x70] sm:$0xff] }
 0x133   : > { %1303 = vmatprep.subr.mxu1 %v1372_v0  ;;  %v739_v12 = vld [vmem:[%s1794_s7 + $0xb0] sm:$0xff] }
 0x134   : > { %v536_v16 = vpop.permute.xlu1 %535  ;;  %v723_v13 = vld [vmem:[%s1794_s7 + $0x30] sm:$0xff] }
 0x135   : > { %1300 = vmatmul.mubr.msk.bf16.vlgmr.msra.gmra.mxu1 %vm620_vm13, %v613_v14  ;;  %v538_v17 = vpop.permute.xlu0 %537 }
 0x136   : > { %1304 = vmatpush3.msra.mxu1 %v1546_v15  ;;  %1311 = vmatprep.mubr.msk.f32.mxu1 %vm1393_vm7, %v1372_v0  ;;  %v542_v26 = vsel %vm541_vm15, %v536_v16, %v538_v17  ;;  %v543_v27 = vsel %vm541_vm15, %v538_v17, %v540_v63  ;;  %v1632_v63 = vld [vmem:[%s1794_s7 + $0xe0] sm:$0xff]  ;;  %v722_v16 = vld [vmem:[%s1794_s7 + $0x28] sm:$0xff] }
 0x137   : > { %1305 = vmatprep.subr.mxu1 %v1372_v0  ;;  %v737_v17 = vld [vmem:[%s1794_s7 + $0xa0] sm:$0xff] }
 0x138   : > { %v545_v19 = vpop.permute.xlu1 %544  ;;  %1306 = vmatpush3.msra.mxu1 %v1552_v18 }
 0x139   : > { %v547_v20 = vpop.permute.xlu0 %546  ;;  %1307 = vmatprep.subr.mxu1 %v1372_v0 }
 0x13a   : > { %v551_v31 = vsel %vm550_vm1, %v545_v19, %v547_v20  ;;  %v552_v35 = vsel %vm550_vm1, %v547_v20, %v549_v4  ;;  %1308 = vmatpush3.msra.mxu1 %v1594_v57  ;;  %v743_v4 = vld [vmem:[%s1794_s7 + $0xd0] sm:$0xff]  ;;  %v1695_v19 = vld [vmem:[%s1794_s7 + $0x20] sm:$0xff]  ;;  %v736_v20 = vld [vmem:[%s1794_s7 + $0x98] sm:$0xff] }
 0x13b   : > { %1309 = vmatprep.subr.mxu1 %v1372_v0 }
 0x13c   : > { %v485_v21 = vpop.permute.xlu1 %484  ;;  %1310 = vmatpush3.msra.mxu1 %v1613_v60 }
 0x13d   : > { %v487_v22 = vpop.permute.xlu0 %486  ;;  %1253 = vmatprep.subr.mxu1 %v748_v56 }
 0x13e   : > { %v492_v32 = vsel %vm490_vm2, %v487_v22, %v489_v3  ;;  %v491_v44 = vsel %vm490_vm2, %v485_v21, %v487_v22  ;;  %v1650_v3 = vld [vmem:[%s1794_s7 + $0x58] sm:$0xff]  ;;  %v735_v22 = vld [vmem:[%s1794_s7 + $0x90] sm:$0xff] }
 0x13f   : > { %v568_v45 = vsel %vm562_vm9, %v1495_v42, %v492_v32  ;;  %v565_v51 = vsel %vm562_vm9, %v1488_v38, %v491_v44  ;;  %v1589_v38 = vld [vmem:[%s1794_s7 + $0x78] sm:$0xff] }
 0x140   : > { %v529_v25 = vpop.permute.xlu1 %528  ;;  %v720_v21 = vld [vmem:[%s1794_s7 + $0x18] sm:$0xff] }
 0x141   : > { %v533_v28 = vsel %vm532_vm0, %v527_v7, %v529_v25  ;;  %v534_v29 = vsel %vm532_vm0, %v529_v25, %v531_v1  ;;  %v499_v30 = vpop.permute.xlu0 %498  ;;  %v1638_v1 = vld [vmem:[%s1794_s7 + $0x60] sm:$0xff]  ;;  %v726_v7 = vld [vmem:[%s1794_s7 + $0x48] sm:$0xff] }
 0x142   : > { %v591_v33 = vsel %vm562_vm9, %v524_v24, %v533_v28  ;;  %v594_v34 = vsel %vm562_vm9, %v525_v23, %v534_v29  ;;  %v504_v36 = vsel %vm502_vm3, %v499_v30, %v501_v8  ;;  %v741_v8 = vld [vmem:[%s1794_s7 + $0xc0] sm:$0xff]  ;;  %v1710_v23 = vld [vmem:[%s1794_s7 + $0x10] sm:$0xff]  ;;  %v1716_v24 = vld [vmem:[%s1794_s7 + $0x88] sm:$0xff]  ;;  %vm1089_vm9 = vcmask 154624  }
 0x143   : > { %v601_v37 = vsel %vm572_vm11, %v594_v34, %v543_v27  ;;  %v599_v39 = vsel %vm572_vm11, %v591_v33, %v542_v26  ;;  %v576_v49 = vsel %vm572_vm11, %v568_v45, %v504_v36  ;;  %v1722_v25 = vld [vmem:[%s1794_s7 + $0x8] sm:$0xff]  ;;  %v1728_v26 = vld [vmem:[%s1794_s7 + $0x80] sm:$0xff] }
 0x144   : > { %v497_v40 = vpop.permute.xlu1 %496  ;;  %v608_v41 = vsel %vm579_vm12, %v601_v37, %v552_v35  ;;  %v605_v43 = vsel %vm579_vm12, %v599_v39, %v551_v31  ;;  %v1734_v27 = vld [vmem:[%s1794_s7] sm:$0xff]  ;;  %v1053_v35 = vlaneseq }
 0x145   : > { %645 = vmatprep.subr.bf16.mxu0 %v608_v41  ;;  %v511_v46 = vpop.permute.xlu0 %510  ;;  %v503_v47 = vsel %vm502_vm3, %v497_v40, %v499_v30 }
 0x146   : > { %v516_v48 = vsel %vm514_vm4, %v511_v46, %v513_v11  ;;  %646 = vmatpush1.bf16.msra.mxu0 %v605_v43  ;;  %v574_v42 = vsel %vm572_vm11, %v565_v51, %v503_v47  ;;  %v724_v11 = vld [vmem:[%s1794_s7 + $0x38] sm:$0xff]  ;;  %v1054_v36 = vshrl.u32 %v1053_v35, 7  ;;  %v1051_v43 = vld [vmem:[%s1793_s6] sm:$0x7]  ;;  %vm1100_vm11 = vcmask 568728  }
 0x147   : > { %v584_v50 = vsel %vm579_vm12, %v576_v49, %v516_v48 }
 0x148   : > { %v509_v53 = vpop.permute.xlu1 %508  ;;  %647 = vmatprep.subr.bf16.mxu0 %v584_v50  ;;  %v1055_v37 = vsub.s32 0, %v1054_v36  ;;  %v1059_v39 = vsub.s32 1, %v1054_v36  ;;  %v1063_v45 = vsub.s32 2, %v1054_v36 }
 0x149   : > { %v515_v54 = vsel %vm514_vm4, %v509_v53, %v511_v46 }
 0x14a   : > { %v581_v55 = vsel %vm579_vm12, %v574_v42, %v515_v54  ;;  %v1056_v47 = vrot.slane %v1051_v43, %v1055_v37  ;;  %v1060_v49 = vrot.slane %v1051_v43, %v1059_v39  ;;  %v1064_v54 = vrot.slane %v1051_v43, %v1063_v45 }
 0x14b   : > { %648 = vmatpush1.bf16.msra.mxu0 %v581_v55  ;;  %vm1047_vm12 = vcmask 7168  }
 0x14c   : > { %1213 = vmatprep.subr.mxu0 %v748_v56 }
 0x14e   : > { %1198 = vmatmul.mubr.msk.bf16.vlgmr.msra.gmra.mxu0 %vm620_vm13, %v613_v14  ;;  %v738_v14 = vld [vmem:[%s1794_s7 + $0xa8] sm:$0xff]  ;;  %vm1049_vm13 = vcmask 15360  }
 0x14f   : > { %1214 = vmatpush3.msra.mxu0 %v1589_v38 }
 0x150   : > { %1215 = vmatprep.subr.mxu0 %v1601_v58 }
 0x151   : > { %1216 = vmatpush3.msra.mxu0 %v1608_v59 }
 0x152   : > { %1217 = vmatprep.subr.mxu0 %v1620_v61  ;;  %v618_v28 = vpop.permute.xlu0 %617 }
 0x153   : > { %1218 = vmatpush3.msra.mxu0 %v1626_v62 }
 0x154   : > { %1219 = vmatprep.subr.mxu0 %v1632_v63 }
 0x155   : > { %1220 = vmatpush3.msra.mxu0 %v1638_v1 }
 0x156   : > { %1221 = vmatprep.subr.mxu0 %v1644_v2 }
 0x157   : > { %1222 = vmatpush3.msra.mxu0 %v1650_v3 }
 0x158   : > { %1223 = vmatprep.subr.mxu0 %v743_v4 }
 0x159   : > { %1224 = vmatpush3.msra.mxu0 %v727_v5 }
 0x15a   : > { %1225 = vmatprep.subr.mxu0 %v742_v6 }
 0x15b   : > { %1226 = vmatpush3.msra.mxu0 %v726_v7 }
 0x15c   : > { %1227 = vmatprep.subr.mxu0 %v741_v8 }
 0x15d   : > { %1228 = vmatpush3.msra.mxu0 %v725_v9 }
 0x15e   : > { %1229 = vmatprep.subr.mxu0 %v740_v10 }
 0x15f   : > { %1230 = vmatpush3.msra.mxu0 %v724_v11 }
 0x160   : > { %1231 = vmatprep.subr.mxu0 %v739_v12 }
 0x161   : > { %1232 = vmatpush3.msra.mxu0 %v723_v13 }
 0x162   : > { %1233 = vmatprep.subr.mxu0 %v738_v14 }
 0x163   : > { %1234 = vmatpush3.msra.mxu0 %v722_v16 }
 0x164   : > { %1235 = vmatprep.subr.mxu0 %v737_v17 }
 0x165   : > { %1236 = vmatpush3.msra.mxu0 %v1695_v19 }
 0x166   : > { %1237 = vmatprep.subr.mxu0 %v736_v20 }
 0x167   : > { %1238 = vmatpush3.msra.mxu0 %v720_v21 }
 0x168   : > { %1239 = vmatprep.subr.mxu0 %v735_v22 }
 0x169   : > { %1240 = vmatpush3.msra.mxu0 %v1710_v23 }
 0x16a   : > { %1241 = vmatprep.subr.mxu0 %v1716_v24 }
 0x16b   : > { %1242 = vmatpush3.msra.mxu0 %v1722_v25 }
 0x16c   : > { %1243 = vmatprep.subr.mxu0 %v1728_v26 }
 0x16d   : > { %1244 = vmatpush3.msra.mxu0 %v1734_v27 }
 0x16e   : > { %1314 = vmatprep.subr.mxu0 %v1372_v0 }
 0x1f5   : > { %v708_v29 = vpop.f32.mrf.mxu1 }
 0x1f6   : > { %v709_v30 = vadd.f32 %v708_v29, %v618_v28 }
 0x1f7   : > { %v1301_v31 = vpop.f32.mrf.mxu1 }
 0x1f8   : > { %v1738_v32 = vmax.f32 %v709_v30, 0.0 }
 0x1f9   : > { %v711_v33 = vpop.f32.mrf.mxu1 }
 0x1fa   : > { %1312 = vmatmul.mubr.msk.f32.vlgmr.msra.gmra.mxu1 %vm753_vm5, %v1738_v32 }
 0x1fb   : > { %1254 = vmatpush3.msra.mxu1 %v1589_v38  ;;  %v1302_v34 = vpop.f32.mrf.mxu1 }
 0x1fc   : > { %1255 = vmatprep.subr.mxu1 %v1601_v58  ;;  %v1070_v58 = vmul.f32 %v1064_v54, %v1738_v32 }
 0x1fd   : > { %1256 = vmatpush3.msra.mxu1 %v1608_v59 }
 0x1fe   : > { %1257 = vmatprep.subr.mxu1 %v1620_v61  ;;  %v899_v61 = vmul.f32 %v1738_v32, %v1738_v32 }
 0x1ff   : > { %1258 = vmatpush3.msra.mxu1 %v1626_v62 }
 0x200   : > { %1259 = vmatprep.subr.mxu1 %v1632_v63 }
 0x201   : > { %1260 = vmatpush3.msra.mxu1 %v1638_v1 }
 0x202   : > { %1261 = vmatprep.subr.mxu1 %v1644_v2 }
 0x203   : > { %1262 = vmatpush3.msra.mxu1 %v1650_v3 }
 0x204   : > { %1263 = vmatprep.subr.mxu1 %v743_v4 }
 0x205   : > { %1264 = vmatpush3.msra.mxu1 %v727_v5 }
 0x206   : > { %1265 = vmatprep.subr.mxu1 %v742_v6 }
 0x207   : > { %1266 = vmatpush3.msra.mxu1 %v726_v7 }
 0x208   : > { %1267 = vmatprep.subr.mxu1 %v741_v8 }
 0x209   : > { %1268 = vmatpush3.msra.mxu1 %v725_v9 }
 0x20a   : > { %1269 = vmatprep.subr.mxu1 %v740_v10 }
 0x20b   : > { %1270 = vmatpush3.msra.mxu1 %v724_v11 }
 0x20c   : > { %1271 = vmatprep.subr.mxu1 %v739_v12 }
 0x20d   : > { %1272 = vmatpush3.msra.mxu1 %v723_v13 }
 0x20e   : > { %1273 = vmatprep.subr.mxu1 %v738_v14  ;;  %v667_v40 = vpop.f32.mrf.mxu0 }
 0x20f   : > { %v668_v41 = vadd.f32 %v667_v40, %v618_v28  ;;  %1274 = vmatpush3.msra.mxu1 %v722_v16 }
 0x210   : > { %1275 = vmatprep.subr.mxu1 %v737_v17  ;;  %v669_v44 = vpop.f32.mrf.mxu0 }
 0x211   : > { %v714_v46 = vmax.f32 %v668_v41, 0.0  ;;  %v670_v48 = vadd.f32 %v669_v44, %v618_v28  ;;  %1276 = vmatpush3.msra.mxu1 %v1695_v19 }
 0x212   : > { %1277 = vmatprep.subr.mxu1 %v736_v20  ;;  %v671_v50 = vpop.f32.mrf.mxu0 }
 0x213   : > { %v715_v51 = vmax.f32 %v670_v48, 0.0  ;;  %1278 = vmatpush3.msra.mxu1 %v720_v21  ;;  %v1068_v42 = vmul.f32 %v1056_v47, %v714_v46  ;;  %v897_v59 = vmul.f32 %v714_v46, %v714_v46 }
 0x214   : > { %1279 = vmatprep.subr.mxu1 %v735_v22  ;;  %v672_v53 = vpop.f32.mrf.mxu0 }
 0x215   : > { %v1069_v55 = vmul.f32 %v1060_v49, %v715_v51  ;;  %1280 = vmatpush3.msra.mxu1 %v1710_v23  ;;  %821 = vmatprep.mubr.f32.mxu0 %v715_v51  ;;  %v898_v56 = vmul.f32 %v715_v51, %v715_v51 }
 0x216   : > { %1281 = vmatprep.subr.mxu1 %v1716_v24  ;;  %822 = vmatmul.mubr.f32.vlgmr.msra.gmra.mxu0 %v714_v46 }
 0x217   : > { %1282 = vmatpush3.msra.mxu1 %v1722_v25  ;;  %1315 = vmatpush3.msra.mxu0 %v1546_v15  ;;  %v1207_v38 = vpack.c.bf16 %v1069_v55, %v1068_v42  ;;  %v1208_v15 = vpack.c.bf16 %v1070_v58, %v1070_v58 }
 0x218   : > { %1283 = vmatprep.subr.mxu1 %v1728_v26  ;;  %967 = vmatprep.mubr.f32.mxu1 %v898_v56 }
 0x219   : > { %1316 = vmatprep.subr.mxu0 %v1372_v0  ;;  %1284 = vmatpush3.msra.mxu1 %v1734_v27 }
 0x21a   : > { %1317 = vmatpush3.msra.mxu0 %v1552_v18  ;;  %1084 = vrot.lane.b32.xlu1 %v1207_v38, %s1374_s13 }
 0x21b   : > { %968 = vmatmul.mubr.f32.vlgmr.msra.gmra.mxu1 %v897_v59  ;;  %1318 = vmatprep.subr.mxu0 %v1372_v0 }
 0x21c   : > { %1319 = vmatpush3.msra.mxu0 %v1594_v57  ;;  %1322 = vmatprep.mubr.msk.f32.mxu0 %vm1393_vm7, %v1372_v0  ;;  %vm1098_vm7 = vcmask 412672  }
 0x21d   : > { %1320 = vmatprep.subr.mxu0 %v1372_v0 }
 0x21e   : > { %1321 = vmatpush3.msra.mxu0 %v1613_v60  ;;  %1086 = vrot.lane.b32.xlu1 %v1208_v15, %s1374_s13  ;;  %s1399_s13 = smov 1  }
 0x21f   : > { %1323 = vmatmul.mubr.msk.f32.vlgmr.msra.gmra.mxu0 %vm753_vm5, %v899_v61 }
 0x28c   : > { %v1085_v18 = vpop.permute.xlu1 %1084 }
 0x28d   : > { %v1088_v57 = vrot.slane %v1085_v18, 4 }
 0x28f   : > { %v1090_v62 = vsel %vm1089_vm9, %v1088_v57, %v1085_v18 }
 0x290   : > { %1097 = vst.msk [vmem:[%s1519_s19] sm:$0xff] %vm1096_vm10, %v1090_v62  ;;  %v1087_v63 = vpop.permute.xlu1 %1086 }
 0x291   : > { %v1091_v0 = vsel %vm1089_vm9, %v1088_v57, %v1087_v63 }
 0x292   : > { %1099 = vst.msk [vmem:[%s1519_s19 + $0x8] sm:$0xf] %vm1098_vm7, %v1091_v0 }
 0x293   : > { %1101 = vst.msk [vmem:[%s1519_s19 + $0x8] sm:$0xf] %vm1100_vm11, %v1398_v52  ;;  %s343_s19 = scalar_lea.vmem %s1796_s9, %s1206_s4 }
 0x2ba   : > { %v893_v60 = vpop.f32.mrf.mxu1 }
 0x2bc   : > { %v1313_v1 = vpop.f32.mrf.mxu1 }
 0x2d6   : > { %v1245_v2 = vpop.f32.mrf.mxu0 }
 0x2d8   : > { %v1246_v3 = vpop.f32.mrf.mxu0 }
 0x2d9   : > { %v1247_v4 = vadd.f32 %v1246_v3, %v1245_v2 }
 0x2db   : > { %v894_v5 = vadd.f32 %v1247_v4, %v893_v60  ;;  %v1285_v6 = vpop.f32.mrf.mxu1 }
 0x2dd   : > { %v1286_v7 = vpop.f32.mrf.mxu1 }
 0x2de   : > { %v1287_v8 = vadd.f32 %v1286_v7, %v1285_v6 }
 0x2df   : > { %v1039_v9 = vpop.f32.mrf.mxu0 }
 0x2e0   : > { %v1040_v10 = vadd.f32 %v1287_v8, %v1039_v9 }
 0x2e1   : > { %v1324_v11 = vpop.f32.mrf.mxu0 }
 0x2e2   : > { %1044 = vrot.lane.b32.xlu0 %v1040_v10, %s1399_s13 }
 0x354   : > { %v1045_v52 = vpop.permute.xlu0 %1044 }
 0x355   : > { %v1048_v12 = vsel %vm1047_vm12, %v894_v5, %v1045_v52 }
 0x356   : > { %1050 = vst.msk [vmem:[%s343_s19] sm:$0xff] %vm1049_vm13, %v1048_v12 }
 0x357 PF: > { %s20_s30 = sadd.s32 1, %s1370_s30  }
 0x358   : > { %p17_p4 = scmp.ge.s32.totalorder %s20_s30, 4  }
 0x35a   :  { %19 = sbr.rel (!%p17_p4) target bundleno = 1 (0x1), region = 94 }

</bundles_post_ra>
